<compile_context>
chip_gen: v7x
topology: tpu7x:2x2x1
jax: 0.10.0
libtpu: 0.0.40
codegen_flags: <defaults>
</compile_context>

<pallas_src>
import functools
import math

import numpy as np

import jax
import jax.numpy as jnp
from jax import lax
from jax.experimental import pallas as pl
from jax.experimental.pallas import tpu as pltpu


_INV_SQRT2 = 1.0 / math.sqrt(2.0)


# -----------------------------------------------------------------------------
# In-kernel helpers (pure value math; everything stays in vregs)
# -----------------------------------------------------------------------------
def _erf(x):
    # Abramowitz & Stegun 7.1.26 rational approximation, |abs err| < 1.5e-7
    # (f32-level accurate).  Used instead of lax.erf so the kernel only relies on
    # guaranteed Mosaic lowerings (abs/mul/add/exp/where) while keeping torch's
    # exact (erf-based) nn.GELU semantics.
    ax = jnp.abs(x)
    t = 1.0 / (1.0 + 0.3275911 * ax)
    poly = ((((1.061405429 * t - 1.453152027) * t + 1.421413741) * t
             - 0.284496736) * t + 0.254829592) * t
    y = 1.0 - poly * jnp.exp(-ax * ax)
    return jnp.where(x < 0, -y, y)


def _gelu(x):
    return 0.5 * x * (1.0 + _erf(x * _INV_SQRT2))


def _layernorm(x, g, b, eps=1e-5):
    mean = jnp.mean(x, axis=-1, keepdims=True)
    xc = x - mean
    var = jnp.mean(xc * xc, axis=-1, keepdims=True)   # biased, like torch LayerNorm
    return xc * lax.rsqrt(var + eps) * g + b


# -----------------------------------------------------------------------------
# Fused forward kernel (one program == one batch element)
# -----------------------------------------------------------------------------
def _fused_forward_kernel(x_ref, enc_w_ref, enc_b_ref, dec_w_ref, dec_b_ref,
                          qkv_w_ref, qkv_b_ref, w3_ref, vec_ref, out_ref,
                          *, N, C, H, scale, depth, n_enc, n_dec, P_dec):
    HS = C // H

    # ---- joint encoder: MLP with identity activation == stacked linears.
    #      Layers are zero-padded to a common (P_enc, P_enc) so they stack; the
    #      padding is exact (zero weights/bias -> padded columns stay zero).
    feat_p = x_ref[...]                                       # (N, P_enc)
    for l in range(n_enc):
        feat_p = jnp.dot(feat_p, enc_w_ref[l],
                         preferred_element_type=jnp.float32) + enc_b_ref[l]
    feat = feat_p[:, :C]                                      # (N, C) valid prefix

    snaps = [feat]                                            # snapshot 0

    # ---- transformer blocks (Block2), statically unrolled over depth ----------
    for d in range(depth):
        w3 = w3_ref[d]                                        # (C, 3C): [proj|fc1|fc2]
        vec = vec_ref[d]                                      # (8, C)
        ln1_g, ln1_b = vec[0:1, :], vec[1:2, :]
        ln2_g, ln2_b = vec[2:3, :], vec[3:4, :]
        proj_b, fc1_b, fc2_b = vec[4:5, :], vec[5:6, :], vec[6:7, :]

        # --- attention branch (all register-resident) ---
        xn = _layernorm(feat, ln1_g, ln1_b)
        qkv = jnp.dot(xn, qkv_w_ref[d],
                      preferred_element_type=jnp.float32) + qkv_b_ref[d]   # (N, 3C)

        head_out = []
        for h in range(H):                                    # static unroll, H small
            q = qkv[:, h * HS:(h + 1) * HS]                   # static lane slices
            k = qkv[:, C + h * HS:C + (h + 1) * HS]
            v = qkv[:, 2 * C + h * HS:2 * C + (h + 1) * HS]
            # Q @ K^T via contraction on the head dim (no relayout of K),
            # scale applied AFTER the matmul (matches torch ordering).
            s = lax.dot_general(q, k, (((1,), (1,)), ((), ())),
                                preferred_element_type=jnp.float32) * scale
            m = jnp.max(s, axis=-1, keepdims=True)
            e = jnp.exp(s - m)
            p = e / jnp.sum(e, axis=-1, keepdims=True)        # exact divide
            head_out.append(jnp.dot(p, v, preferred_element_type=jnp.float32))
        attn = jnp.concatenate(head_out, axis=1)              # (N, C), lane-dense value

        feat = feat + (jnp.dot(attn, w3[:, 0:C],
                               preferred_element_type=jnp.float32) + proj_b)

        # --- MLP branch (hidden = dim, exact GELU) ---
        xn2 = _layernorm(feat, ln2_g, ln2_b)
        hmid = jnp.dot(xn2, w3[:, C:2 * C],
                       preferred_element_type=jnp.float32) + fc1_b
        hmid = _gelu(hmid)
        feat = feat + (jnp.dot(hmid, w3[:, 2 * C:3 * C],
                               preferred_element_type=jnp.float32) + fc2_b)

        snaps.append(feat)

    # ---- single batched joint-decoder pass over all (depth+1) snapshots -------
    y = jnp.concatenate(snaps, axis=0)                        # ((depth+1)*N, C)
    if P_dec > C:                                             # lane-pad (exact, zeros)
        y = jnp.concatenate(
            [y, jnp.zeros((y.shape[0], P_dec - C), jnp.float32)], axis=1)
    for l in range(n_dec):
        y = jnp.dot(y, dec_w_ref[l],
                    preferred_element_type=jnp.float32) + dec_b_ref[l]
    out_ref[...] = y                                          # full-width lane-dense store


# -----------------------------------------------------------------------------
# jit-ted wrapper: packs params into a few slabs, builds the single pallas_call
# -----------------------------------------------------------------------------
def _round_up(x, m):
    return ((x + m - 1) // m) * m


@functools.partial(jax.jit, static_argnames=("num_heads", "qk_scale"))
def jr_transformer_forward(params, x_joint, *, num_heads, qk_scale=0.6):
    """y_joint == 0 branch of JRTransformer.forward (eval mode: dropout/drop_path = id)."""
    B, J, T, D = x_joint.shape
    enc = params["joint_encoder"]
    dec = params["joint_decoder"]
    blocks = params["attn_encoder3"]
    depth = len(blocks)
    n_enc, n_dec = len(enc), len(dec)
    in_size = T * D
    C = enc[-1][0].shape[1]
    out_size = dec[-1][0].shape[1]
    H = num_heads

    assert C % H == 0, "feat_size must be divisible by num_heads"
    assert out_size % 3 == 0, "out_joint_size must be divisible by 3"
    assert J % 8 == 0, "J must be a multiple of 8 (sublane tile) for per-batch grid"

    # Common padded widths (multiples of 128) for stacked encoder / decoder slabs.
    P_enc = _round_up(max([in_size] + [w.shape[1] for (w, _) in enc]), 128)
    P_dec = _round_up(max([C] + [w.shape[1] for (w, _) in dec]), 128)

    def pad_stack(layers, P):
        ws, bs = [], []
        for (w, b) in layers:
            ws.append(jnp.zeros((P, P), jnp.float32).at[:w.shape[0], :w.shape[1]].set(w))
            bs.append(jnp.zeros((1, P), jnp.float32).at[0, :b.shape[0]].set(b))
        return jnp.stack(ws), jnp.stack(bs)

    enc_w, enc_b = pad_stack(enc, P_enc)          # (n_enc, P_enc, P_enc), (n_enc, 1, P_enc)
    dec_w, dec_b = pad_stack(dec, P_dec)          # (n_dec, P_dec, P_dec), (n_dec, 1, P_dec)

    qkv_w = jnp.stack([blk["qkv_w"] for blk in blocks])                      # (depth, C, 3C)
    qkv_b = jnp.stack([blk["qkv_b"].reshape(1, 3 * C) for blk in blocks])    # (depth, 1, 3C)
    w3 = jnp.stack([jnp.concatenate([blk["proj_w"], blk["fc1_w"], blk["fc2_w"]], axis=1)
                    for blk in blocks])                                      # (depth, C, 3C)
    vec = jnp.stack([jnp.stack([blk["norm_attn_g"], blk["norm_attn_b"],
                                blk["norm_joint_g"], blk["norm_joint_b"],
                                blk["proj_b"], blk["fc1_b"], blk["fc2_b"],
                                jnp.zeros((C,), jnp.float32)])
                     for blk in blocks])                                     # (depth, 8, C)

    x = x_joint.reshape(B * J, in_size).astype(jnp.float32)
    if P_enc > in_size:
        x = jnp.concatenate(
            [x, jnp.zeros((B * J, P_enc - in_size), jnp.float32)], axis=1)   # (B*J, P_enc)

    N = J
    R = (depth + 1) * N

    kernel = functools.partial(
        _fused_forward_kernel,
        N=N, C=C, H=H, scale=float(qk_scale),
        depth=depth, n_enc=n_enc, n_dec=n_dec, P_dec=P_dec)

    out = pl.pallas_call(
        kernel,
        out_shape=jax.ShapeDtypeStruct((B * R, P_dec), jnp.float32),
        grid=(B,),
        in_specs=[
            pl.BlockSpec((N, P_enc), lambda b: (b, 0)),            # x: one batch per program
            pl.BlockSpec(enc_w.shape, lambda b: (0, 0, 0)),        # weight slabs: resident
            pl.BlockSpec(enc_b.shape, lambda b: (0, 0, 0)),
            pl.BlockSpec(dec_w.shape, lambda b: (0, 0, 0)),
            pl.BlockSpec(dec_b.shape, lambda b: (0, 0, 0)),
            pl.BlockSpec(qkv_w.shape, lambda b: (0, 0, 0)),
            pl.BlockSpec(qkv_b.shape, lambda b: (0, 0, 0)),
            pl.BlockSpec(w3.shape, lambda b: (0, 0, 0)),
            pl.BlockSpec(vec.shape, lambda b: (0, 0, 0)),
        ],
        out_specs=pl.BlockSpec((R, P_dec), lambda b: (b, 0)),
        compiler_params=pltpu.CompilerParams(
            dimension_semantics=("parallel",)),                    # v7x: one batch per TC
    )(x, enc_w, enc_b, dec_w, dec_b, qkv_w, qkv_b, w3, vec)

    # Layout: (B, depth+1, J, P_dec) -> take valid columns, torch-style output order.
    out = out.reshape(B, depth + 1, J, P_dec)[..., :out_size]
    out = jnp.transpose(out, (1, 0, 2, 3)).reshape(depth + 1, B, J, out_size // 3, 3)
    pred_aux = [out[i] for i in range(depth + 1)]
    pred = out[depth]                  # decode(feat) after the last block
    return pred, pred_aux


def jr_transformer_apply(params, x_joint, *, num_heads, qk_scale=0.6,
                         y_joint_is_zero=True):
    # Branch selection is a host-side static flag: no per-call device round-trip.
    if not y_joint_is_zero:
        # TODO(synk): the y_joint != 0 branch calls undefined helpers (distance_ab /
        # vel_ab / acc_ab) and builds a fresh randomly initialized MLP at forward
        # time; it has no deterministic Pallas translation.
        raise NotImplementedError("only the y_joint == 0 branch is implemented")
    return jr_transformer_forward(params, x_joint,
                                  num_heads=num_heads, qk_scale=qk_scale)


# -----------------------------------------------------------------------------
# Deterministic parameter init (xavier_uniform weights, zero bias, LN = 1/0),
# matching JRTransformer._init_weights.  Weights stored transposed as (in, out).
# -----------------------------------------------------------------------------
def _xavier(key, fan_in, fan_out):
    a = math.sqrt(6.0 / (fan_in + fan_out))
    return jax.random.uniform(key, (fan_in, fan_out), jnp.float32, -a, a)


def _linear_params(key, fan_in, fan_out):
    return (_xavier(key, fan_in, fan_out), jnp.zeros((fan_out,), jnp.float32))


def init_params(key, in_joint_size, feat_size, out_joint_size, depth,
                enc_hid=(64, 128), dec_hid=(128, 64)):
    keys = iter(jax.random.split(key, 4 * depth + 16))
    params = {}

    enc_dims = (in_joint_size,) + enc_hid + (feat_size,)
    params["joint_encoder"] = [
        _linear_params(next(keys), enc_dims[i], enc_dims[i + 1])
        for i in range(len(enc_dims) - 1)]
    dec_dims = (feat_size,) + dec_hid + (out_joint_size,)
    params["joint_decoder"] = [
        _linear_params(next(keys), dec_dims[i], dec_dims[i + 1])
        for i in range(len(dec_dims) - 1)]

    blocks = []
    for _ in range(depth):
        qkv_w, qkv_b = _linear_params(next(keys), feat_size, 3 * feat_size)
        proj_w, proj_b = _linear_params(next(keys), feat_size, feat_size)
        fc1_w, fc1_b = _linear_params(next(keys), feat_size, feat_size)  # hidden = dim
        fc2_w, fc2_b = _linear_params(next(keys), feat_size, feat_size)
        blocks.append(dict(
            norm_attn_g=jnp.ones((feat_size,), jnp.float32),
            norm_attn_b=jnp.zeros((feat_size,), jnp.float32),
            norm_joint_g=jnp.ones((feat_size,), jnp.float32),
            norm_joint_b=jnp.zeros((feat_size,), jnp.float32),
            qkv_w=qkv_w, qkv_b=qkv_b,
            proj_w=proj_w, proj_b=proj_b,
            fc1_w=fc1_w, fc1_b=fc1_b,
            fc2_w=fc2_w, fc2_b=fc2_b,
        ))
    params["attn_encoder3"] = blocks
    return params


# -----------------------------------------------------------------------------
if __name__ == "__main__":
    key = jax.random.PRNGKey(0)
    B, J, T, D = 2, 8, 5, 9            # in_joint_size = T*D = 45
    feat_size, num_heads, depth = 32, 4, 2
    out_joint_size = 12                # -> pred shape (B, J, 4, 3)

    pkey, xkey = jax.random.split(key)
    params = init_params(pkey, T * D, feat_size, out_joint_size, depth)

    x_joint = jax.random.normal(xkey, (B, J, T, D), jnp.float32)
    y_joint = np.zeros((B, J, T, D), np.float32)          # host-side branch input
    y_is_zero = bool(np.all(y_joint == 0))                 # resolved on host, no sync

    pred, pred_aux = jr_transformer_apply(params, x_joint,
                                          num_heads=num_heads, qk_scale=0.6,
                                          y_joint_is_zero=y_is_zero)
    jax.block_until_ready(pred)
    jax.block_until_ready(pred_aux)

    assert pred.shape == (B, J, out_joint_size // 3, 3)
    assert len(pred_aux) == depth + 1
    assert all(p.shape == pred.shape for p in pred_aux)
    assert all(jnp.isfinite(p).all() for p in pred_aux)
    print("KERNEL_OK")
</pallas_src>

<mosaic_0001>
module attributes {stable_mosaic.version = 11 : i64} {
  func.func @_fused_forward_kernel(%arg0: i32, %arg1: memref<8x128xf32, #tpu.memory_space<vmem>>, %arg2: memref<3x128x128xf32, #tpu.memory_space<vmem>>, %arg3: memref<3x1x128xf32, #tpu.memory_space<vmem>>, %arg4: memref<3x128x128xf32, #tpu.memory_space<vmem>>, %arg5: memref<3x1x128xf32, #tpu.memory_space<vmem>>, %arg6: memref<2x32x96xf32, #tpu.memory_space<vmem>>, %arg7: memref<2x1x96xf32, #tpu.memory_space<vmem>>, %arg8: memref<2x32x96xf32, #tpu.memory_space<vmem>>, %arg9: memref<2x8x32xf32, #tpu.memory_space<vmem>>, %arg10: memref<24x128xf32, #tpu.memory_space<vmem>>) attributes {dimension_semantics = [#tpu.dimension_semantics<parallel>], iteration_bounds = array<i64: 2>, scalar_prefetch = 0 : i64, scratch_operands = 0 : i64, tpu.core_type = #tpu.core_type<tc>, window_params = [{transform_indices = @transform_0, window_bounds = array<i64: 8, 128>}, {pipeline_mode = #tpu.pipeline_mode<synchronous>, transform_indices = @transform_1, window_bounds = array<i64: 3, 128, 128>}, {pipeline_mode = #tpu.pipeline_mode<synchronous>, transform_indices = @transform_2, window_bounds = array<i64: 3, 1, 128>}, {pipeline_mode = #tpu.pipeline_mode<synchronous>, transform_indices = @transform_3, window_bounds = array<i64: 3, 128, 128>}, {pipeline_mode = #tpu.pipeline_mode<synchronous>, transform_indices = @transform_4, window_bounds = array<i64: 3, 1, 128>}, {pipeline_mode = #tpu.pipeline_mode<synchronous>, transform_indices = @transform_5, window_bounds = array<i64: 2, 32, 96>}, {pipeline_mode = #tpu.pipeline_mode<synchronous>, transform_indices = @transform_6, window_bounds = array<i64: 2, 1, 96>}, {pipeline_mode = #tpu.pipeline_mode<synchronous>, transform_indices = @transform_7, window_bounds = array<i64: 2, 32, 96>}, {pipeline_mode = #tpu.pipeline_mode<synchronous>, transform_indices = @transform_8, window_bounds = array<i64: 2, 8, 32>}, {transform_indices = @transform_9, window_bounds = array<i64: 24, 128>}]} {
    %c0 = arith.constant 0 : index
    %c0_0 = arith.constant 0 : index
    %0 = vector.load %arg1[%c0, %c0_0] : memref<8x128xf32, #tpu.memory_space<vmem>>, vector<8x128xf32>
    %c0_1 = arith.constant 0 : index
    %c0_2 = arith.constant 0 : index
    %c0_3 = arith.constant 0 : index
    %1 = vector.load %arg2[%c0_1, %c0_2, %c0_3] : memref<3x128x128xf32, #tpu.memory_space<vmem>>, vector<1x128x128xf32>
    %2 = vector.shape_cast %1 : vector<1x128x128xf32> to vector<128x128xf32>
    %cst = arith.constant dense<0.000000e+00> : vector<8x128xf32>
    %3 = tpu.matmul %0, %2, %cst {dimension_numbers = #tpu.dot_dimension_numbers<[1], [0], [0], [1], [0, 0, 1, 1], [], []>} : vector<8x128xf32>, vector<128x128xf32>, vector<8x128xf32> -> vector<8x128xf32>
    %c0_4 = arith.constant 0 : index
    %c0_5 = arith.constant 0 : index
    %c0_6 = arith.constant 0 : index
    %4 = vector.load %arg3[%c0_4, %c0_5, %c0_6] : memref<3x1x128xf32, #tpu.memory_space<vmem>>, vector<1x1x128xf32>
    %5 = vector.shape_cast %4 : vector<1x1x128xf32> to vector<1x128xf32>
    %6 = vector.broadcast %5 : vector<1x128xf32> to vector<8x128xf32>
    %7 = arith.addf %3, %6 : vector<8x128xf32>
    %c1 = arith.constant 1 : index
    %c0_7 = arith.constant 0 : index
    %c0_8 = arith.constant 0 : index
    %8 = vector.load %arg2[%c1, %c0_7, %c0_8] : memref<3x128x128xf32, #tpu.memory_space<vmem>>, vector<1x128x128xf32>
    %9 = vector.shape_cast %8 : vector<1x128x128xf32> to vector<128x128xf32>
    %cst_9 = arith.constant dense<0.000000e+00> : vector<8x128xf32>
    %10 = tpu.matmul %7, %9, %cst_9 {dimension_numbers = #tpu.dot_dimension_numbers<[1], [0], [0], [1], [0, 0, 1, 1], [], []>} : vector<8x128xf32>, vector<128x128xf32>, vector<8x128xf32> -> vector<8x128xf32>
    %c1_10 = arith.constant 1 : index
    %c0_11 = arith.constant 0 : index
    %c0_12 = arith.constant 0 : index
    %11 = vector.load %arg3[%c1_10, %c0_11, %c0_12] : memref<3x1x128xf32, #tpu.memory_space<vmem>>, vector<1x1x128xf32>
    %12 = vector.shape_cast %11 : vector<1x1x128xf32> to vector<1x128xf32>
    %13 = vector.broadcast %12 : vector<1x128xf32> to vector<8x128xf32>
    %14 = arith.addf %10, %13 : vector<8x128xf32>
    %c2 = arith.constant 2 : index
    %c0_13 = arith.constant 0 : index
    %c0_14 = arith.constant 0 : index
    %15 = vector.load %arg2[%c2, %c0_13, %c0_14] : memref<3x128x128xf32, #tpu.memory_space<vmem>>, vector<1x128x128xf32>
    %16 = vector.shape_cast %15 : vector<1x128x128xf32> to vector<128x128xf32>
    %cst_15 = arith.constant dense<0.000000e+00> : vector<8x128xf32>
    %17 = tpu.matmul %14, %16, %cst_15 {dimension_numbers = #tpu.dot_dimension_numbers<[1], [0], [0], [1], [0, 0, 1, 1], [], []>} : vector<8x128xf32>, vector<128x128xf32>, vector<8x128xf32> -> vector<8x128xf32>
    %c2_16 = arith.constant 2 : index
    %c0_17 = arith.constant 0 : index
    %c0_18 = arith.constant 0 : index
    %18 = vector.load %arg3[%c2_16, %c0_17, %c0_18] : memref<3x1x128xf32, #tpu.memory_space<vmem>>, vector<1x1x128xf32>
    %19 = vector.shape_cast %18 : vector<1x1x128xf32> to vector<1x128xf32>
    %20 = vector.broadcast %19 : vector<1x128xf32> to vector<8x128xf32>
    %21 = arith.addf %17, %20 : vector<8x128xf32>
    %22 = vector.extract_strided_slice %21 {offsets = [0, 0], sizes = [8, 32], strides = [1, 1]} : vector<8x128xf32> to vector<8x32xf32>
    %c0_19 = arith.constant 0 : index
    %c0_20 = arith.constant 0 : index
    %c0_21 = arith.constant 0 : index
    %23 = vector.load %arg8[%c0_19, %c0_20, %c0_21] : memref<2x32x96xf32, #tpu.memory_space<vmem>>, vector<1x32x96xf32>
    %24 = vector.shape_cast %23 : vector<1x32x96xf32> to vector<32x96xf32>
    %c0_22 = arith.constant 0 : index
    %c0_23 = arith.constant 0 : index
    %c0_24 = arith.constant 0 : index
    %25 = vector.load %arg9[%c0_22, %c0_23, %c0_24] : memref<2x8x32xf32, #tpu.memory_space<vmem>>, vector<1x8x32xf32>
    %26 = vector.shape_cast %25 : vector<1x8x32xf32> to vector<8x32xf32>
    %27 = vector.extract_strided_slice %26 {offsets = [0, 0], sizes = [1, 32], strides = [1, 1]} : vector<8x32xf32> to vector<1x32xf32>
    %28 = vector.extract_strided_slice %26 {offsets = [1, 0], sizes = [1, 32], strides = [1, 1]} : vector<8x32xf32> to vector<1x32xf32>
    %29 = vector.extract_strided_slice %26 {offsets = [2, 0], sizes = [1, 32], strides = [1, 1]} : vector<8x32xf32> to vector<1x32xf32>
    %30 = vector.extract_strided_slice %26 {offsets = [3, 0], sizes = [1, 32], strides = [1, 1]} : vector<8x32xf32> to vector<1x32xf32>
    %31 = vector.extract_strided_slice %26 {offsets = [4, 0], sizes = [1, 32], strides = [1, 1]} : vector<8x32xf32> to vector<1x32xf32>
    %32 = vector.extract_strided_slice %26 {offsets = [5, 0], sizes = [1, 32], strides = [1, 1]} : vector<8x32xf32> to vector<1x32xf32>
    %33 = vector.extract_strided_slice %26 {offsets = [6, 0], sizes = [1, 32], strides = [1, 1]} : vector<8x32xf32> to vector<1x32xf32>
    %cst_25 = arith.constant dense<0.000000e+00> : vector<8xf32>
    %34 = vector.multi_reduction <add>, %22, %cst_25 [1] : vector<8x32xf32> to vector<8xf32>
    %35 = vector.shape_cast %34 : vector<8xf32> to vector<8x1xf32>
    %cst_26 = arith.constant 3.200000e+01 : f32
    %36 = vector.broadcast %cst_26 : f32 to vector<8x1xf32>
    %37 = arith.divf %35, %36 : vector<8x1xf32>
    %38 = vector.broadcast %37 : vector<8x1xf32> to vector<8x32xf32>
    %39 = arith.subf %22, %38 : vector<8x32xf32>
    %40 = arith.mulf %39, %39 : vector<8x32xf32>
    %cst_27 = arith.constant dense<0.000000e+00> : vector<8xf32>
    %41 = vector.multi_reduction <add>, %40, %cst_27 [1] : vector<8x32xf32> to vector<8xf32>
    %42 = vector.shape_cast %41 : vector<8xf32> to vector<8x1xf32>
    %cst_28 = arith.constant 3.200000e+01 : f32
    %43 = vector.broadcast %cst_28 : f32 to vector<8x1xf32>
    %44 = arith.divf %42, %43 : vector<8x1xf32>
    %cst_29 = arith.constant 9.99999974E-6 : f32
    %45 = vector.broadcast %cst_29 : f32 to vector<8x1xf32>
    %46 = arith.addf %44, %45 : vector<8x1xf32>
    %47 = math.rsqrt %46 : vector<8x1xf32>
    %48 = vector.broadcast %47 : vector<8x1xf32> to vector<8x32xf32>
    %49 = arith.mulf %39, %48 : vector<8x32xf32>
    %50 = vector.broadcast %27 : vector<1x32xf32> to vector<8x32xf32>
    %51 = arith.mulf %49, %50 : vector<8x32xf32>
    %52 = vector.broadcast %28 : vector<1x32xf32> to vector<8x32xf32>
    %53 = arith.addf %51, %52 : vector<8x32xf32>
    %c0_30 = arith.constant 0 : index
    %c0_31 = arith.constant 0 : index
    %c0_32 = arith.constant 0 : index
    %54 = vector.load %arg6[%c0_30, %c0_31, %c0_32] : memref<2x32x96xf32, #tpu.memory_space<vmem>>, vector<1x32x96xf32>
    %55 = vector.shape_cast %54 : vector<1x32x96xf32> to vector<32x96xf32>
    %cst_33 = arith.constant dense<0.000000e+00> : vector<8x96xf32>
    %56 = tpu.matmul %53, %55, %cst_33 {dimension_numbers = #tpu.dot_dimension_numbers<[1], [0], [0], [1], [0, 0, 1, 1], [], []>} : vector<8x32xf32>, vector<32x96xf32>, vector<8x96xf32> -> vector<8x96xf32>
    %c0_34 = arith.constant 0 : index
    %c0_35 = arith.constant 0 : index
    %c0_36 = arith.constant 0 : index
    %57 = vector.load %arg7[%c0_34, %c0_35, %c0_36] : memref<2x1x96xf32, #tpu.memory_space<vmem>>, vector<1x1x96xf32>
    %58 = vector.shape_cast %57 : vector<1x1x96xf32> to vector<1x96xf32>
    %59 = vector.broadcast %58 : vector<1x96xf32> to vector<8x96xf32>
    %60 = arith.addf %56, %59 : vector<8x96xf32>
    %61 = vector.extract_strided_slice %60 {offsets = [0, 0], sizes = [8, 8], strides = [1, 1]} : vector<8x96xf32> to vector<8x8xf32>
    %62 = vector.extract_strided_slice %60 {offsets = [0, 32], sizes = [8, 8], strides = [1, 1]} : vector<8x96xf32> to vector<8x8xf32>
    %63 = vector.extract_strided_slice %60 {offsets = [0, 64], sizes = [8, 8], strides = [1, 1]} : vector<8x96xf32> to vector<8x8xf32>
    %cst_37 = arith.constant dense<0.000000e+00> : vector<8x8xf32>
    %64 = tpu.matmul %61, %62, %cst_37 {dimension_numbers = #tpu.dot_dimension_numbers<[1], [1], [0], [0], [0, 0, 1, 0], [], []>} : vector<8x8xf32>, vector<8x8xf32>, vector<8x8xf32> -> vector<8x8xf32>
    %cst_38 = arith.constant 6.000000e-01 : f32
    %65 = vector.broadcast %cst_38 : f32 to vector<8x8xf32>
    %66 = arith.mulf %64, %65 : vector<8x8xf32>
    %cst_39 = arith.constant dense<0xFF800000> : vector<8xf32>
    %67 = vector.multi_reduction <maximumf>, %66, %cst_39 [1] : vector<8x8xf32> to vector<8xf32>
    %68 = vector.shape_cast %67 : vector<8xf32> to vector<8x1xf32>
    %69 = vector.broadcast %68 : vector<8x1xf32> to vector<8x8xf32>
    %70 = arith.subf %66, %69 : vector<8x8xf32>
    %71 = math.exp %70 : vector<8x8xf32>
    %cst_40 = arith.constant dense<0.000000e+00> : vector<8xf32>
    %72 = vector.multi_reduction <add>, %71, %cst_40 [1] : vector<8x8xf32> to vector<8xf32>
    %73 = vector.shape_cast %72 : vector<8xf32> to vector<8x1xf32>
    %74 = vector.broadcast %73 : vector<8x1xf32> to vector<8x8xf32>
    %75 = arith.divf %71, %74 : vector<8x8xf32>
    %cst_41 = arith.constant dense<0.000000e+00> : vector<8x8xf32>
    %76 = tpu.matmul %75, %63, %cst_41 {dimension_numbers = #tpu.dot_dimension_numbers<[1], [0], [0], [1], [0, 0, 1, 1], [], []>} : vector<8x8xf32>, vector<8x8xf32>, vector<8x8xf32> -> vector<8x8xf32>
    %77 = vector.extract_strided_slice %60 {offsets = [0, 8], sizes = [8, 8], strides = [1, 1]} : vector<8x96xf32> to vector<8x8xf32>
    %78 = vector.extract_strided_slice %60 {offsets = [0, 40], sizes = [8, 8], strides = [1, 1]} : vector<8x96xf32> to vector<8x8xf32>
    %79 = vector.extract_strided_slice %60 {offsets = [0, 72], sizes = [8, 8], strides = [1, 1]} : vector<8x96xf32> to vector<8x8xf32>
    %cst_42 = arith.constant dense<0.000000e+00> : vector<8x8xf32>
    %80 = tpu.matmul %77, %78, %cst_42 {dimension_numbers = #tpu.dot_dimension_numbers<[1], [1], [0], [0], [0, 0, 1, 0], [], []>} : vector<8x8xf32>, vector<8x8xf32>, vector<8x8xf32> -> vector<8x8xf32>
    %cst_43 = arith.constant 6.000000e-01 : f32
    %81 = vector.broadcast %cst_43 : f32 to vector<8x8xf32>
    %82 = arith.mulf %80, %81 : vector<8x8xf32>
    %cst_44 = arith.constant dense<0xFF800000> : vector<8xf32>
    %83 = vector.multi_reduction <maximumf>, %82, %cst_44 [1] : vector<8x8xf32> to vector<8xf32>
    %84 = vector.shape_cast %83 : vector<8xf32> to vector<8x1xf32>
    %85 = vector.broadcast %84 : vector<8x1xf32> to vector<8x8xf32>
    %86 = arith.subf %82, %85 : vector<8x8xf32>
    %87 = math.exp %86 : vector<8x8xf32>
    %cst_45 = arith.constant dense<0.000000e+00> : vector<8xf32>
    %88 = vector.multi_reduction <add>, %87, %cst_45 [1] : vector<8x8xf32> to vector<8xf32>
    %89 = vector.shape_cast %88 : vector<8xf32> to vector<8x1xf32>
    %90 = vector.broadcast %89 : vector<8x1xf32> to vector<8x8xf32>
    %91 = arith.divf %87, %90 : vector<8x8xf32>
    %cst_46 = arith.constant dense<0.000000e+00> : vector<8x8xf32>
    %92 = tpu.matmul %91, %79, %cst_46 {dimension_numbers = #tpu.dot_dimension_numbers<[1], [0], [0], [1], [0, 0, 1, 1], [], []>} : vector<8x8xf32>, vector<8x8xf32>, vector<8x8xf32> -> vector<8x8xf32>
    %93 = vector.extract_strided_slice %60 {offsets = [0, 16], sizes = [8, 8], strides = [1, 1]} : vector<8x96xf32> to vector<8x8xf32>
    %94 = vector.extract_strided_slice %60 {offsets = [0, 48], sizes = [8, 8], strides = [1, 1]} : vector<8x96xf32> to vector<8x8xf32>
    %95 = vector.extract_strided_slice %60 {offsets = [0, 80], sizes = [8, 8], strides = [1, 1]} : vector<8x96xf32> to vector<8x8xf32>
    %cst_47 = arith.constant dense<0.000000e+00> : vector<8x8xf32>
    %96 = tpu.matmul %93, %94, %cst_47 {dimension_numbers = #tpu.dot_dimension_numbers<[1], [1], [0], [0], [0, 0, 1, 0], [], []>} : vector<8x8xf32>, vector<8x8xf32>, vector<8x8xf32> -> vector<8x8xf32>
    %cst_48 = arith.constant 6.000000e-01 : f32
    %97 = vector.broadcast %cst_48 : f32 to vector<8x8xf32>
    %98 = arith.mulf %96, %97 : vector<8x8xf32>
    %cst_49 = arith.constant dense<0xFF800000> : vector<8xf32>
    %99 = vector.multi_reduction <maximumf>, %98, %cst_49 [1] : vector<8x8xf32> to vector<8xf32>
    %100 = vector.shape_cast %99 : vector<8xf32> to vector<8x1xf32>
    %101 = vector.broadcast %100 : vector<8x1xf32> to vector<8x8xf32>
    %102 = arith.subf %98, %101 : vector<8x8xf32>
    %103 = math.exp %102 : vector<8x8xf32>
    %cst_50 = arith.constant dense<0.000000e+00> : vector<8xf32>
    %104 = vector.multi_reduction <add>, %103, %cst_50 [1] : vector<8x8xf32> to vector<8xf32>
    %105 = vector.shape_cast %104 : vector<8xf32> to vector<8x1xf32>
    %106 = vector.broadcast %105 : vector<8x1xf32> to vector<8x8xf32>
    %107 = arith.divf %103, %106 : vector<8x8xf32>
    %cst_51 = arith.constant dense<0.000000e+00> : vector<8x8xf32>
    %108 = tpu.matmul %107, %95, %cst_51 {dimension_numbers = #tpu.dot_dimension_numbers<[1], [0], [0], [1], [0, 0, 1, 1], [], []>} : vector<8x8xf32>, vector<8x8xf32>, vector<8x8xf32> -> vector<8x8xf32>
    %109 = vector.extract_strided_slice %60 {offsets = [0, 24], sizes = [8, 8], strides = [1, 1]} : vector<8x96xf32> to vector<8x8xf32>
    %110 = vector.extract_strided_slice %60 {offsets = [0, 56], sizes = [8, 8], strides = [1, 1]} : vector<8x96xf32> to vector<8x8xf32>
    %111 = vector.extract_strided_slice %60 {offsets = [0, 88], sizes = [8, 8], strides = [1, 1]} : vector<8x96xf32> to vector<8x8xf32>
    %cst_52 = arith.constant dense<0.000000e+00> : vector<8x8xf32>
    %112 = tpu.matmul %109, %110, %cst_52 {dimension_numbers = #tpu.dot_dimension_numbers<[1], [1], [0], [0], [0, 0, 1, 0], [], []>} : vector<8x8xf32>, vector<8x8xf32>, vector<8x8xf32> -> vector<8x8xf32>
    %cst_53 = arith.constant 6.000000e-01 : f32
    %113 = vector.broadcast %cst_53 : f32 to vector<8x8xf32>
    %114 = arith.mulf %112, %113 : vector<8x8xf32>
    %cst_54 = arith.constant dense<0xFF800000> : vector<8xf32>
    %115 = vector.multi_reduction <maximumf>, %114, %cst_54 [1] : vector<8x8xf32> to vector<8xf32>
    %116 = vector.shape_cast %115 : vector<8xf32> to vector<8x1xf32>
    %117 = vector.broadcast %116 : vector<8x1xf32> to vector<8x8xf32>
    %118 = arith.subf %114, %117 : vector<8x8xf32>
    %119 = math.exp %118 : vector<8x8xf32>
    %cst_55 = arith.constant dense<0.000000e+00> : vector<8xf32>
    %120 = vector.multi_reduction <add>, %119, %cst_55 [1] : vector<8x8xf32> to vector<8xf32>
    %121 = vector.shape_cast %120 : vector<8xf32> to vector<8x1xf32>
    %122 = vector.broadcast %121 : vector<8x1xf32> to vector<8x8xf32>
    %123 = arith.divf %119, %122 : vector<8x8xf32>
    %cst_56 = arith.constant dense<0.000000e+00> : vector<8x8xf32>
    %124 = tpu.matmul %123, %111, %cst_56 {dimension_numbers = #tpu.dot_dimension_numbers<[1], [0], [0], [1], [0, 0, 1, 1], [], []>} : vector<8x8xf32>, vector<8x8xf32>, vector<8x8xf32> -> vector<8x8xf32>
    %125 = tpu.concatenate %76, %92, %108, %124 in 1 : vector<8x8xf32>, vector<8x8xf32>, vector<8x8xf32>, vector<8x8xf32> -> vector<8x32xf32>
    %126 = vector.extract_strided_slice %24 {offsets = [0, 0], sizes = [32, 32], strides = [1, 1]} : vector<32x96xf32> to vector<32x32xf32>
    %cst_57 = arith.constant dense<0.000000e+00> : vector<8x32xf32>
    %127 = tpu.matmul %125, %126, %cst_57 {dimension_numbers = #tpu.dot_dimension_numbers<[1], [0], [0], [1], [0, 0, 1, 1], [], []>} : vector<8x32xf32>, vector<32x32xf32>, vector<8x32xf32> -> vector<8x32xf32>
    %128 = vector.broadcast %31 : vector<1x32xf32> to vector<8x32xf32>
    %129 = arith.addf %127, %128 : vector<8x32xf32>
    %130 = arith.addf %22, %129 : vector<8x32xf32>
    %cst_58 = arith.constant dense<0.000000e+00> : vector<8xf32>
    %131 = vector.multi_reduction <add>, %130, %cst_58 [1] : vector<8x32xf32> to vector<8xf32>
    %132 = vector.shape_cast %131 : vector<8xf32> to vector<8x1xf32>
    %cst_59 = arith.constant 3.200000e+01 : f32
    %133 = vector.broadcast %cst_59 : f32 to vector<8x1xf32>
    %134 = arith.divf %132, %133 : vector<8x1xf32>
    %135 = vector.broadcast %134 : vector<8x1xf32> to vector<8x32xf32>
    %136 = arith.subf %130, %135 : vector<8x32xf32>
    %137 = arith.mulf %136, %136 : vector<8x32xf32>
    %cst_60 = arith.constant dense<0.000000e+00> : vector<8xf32>
    %138 = vector.multi_reduction <add>, %137, %cst_60 [1] : vector<8x32xf32> to vector<8xf32>
    %139 = vector.shape_cast %138 : vector<8xf32> to vector<8x1xf32>
    %cst_61 = arith.constant 3.200000e+01 : f32
    %140 = vector.broadcast %cst_61 : f32 to vector<8x1xf32>
    %141 = arith.divf %139, %140 : vector<8x1xf32>
    %cst_62 = arith.constant 9.99999974E-6 : f32
    %142 = vector.broadcast %cst_62 : f32 to vector<8x1xf32>
    %143 = arith.addf %141, %142 : vector<8x1xf32>
    %144 = math.rsqrt %143 : vector<8x1xf32>
    %145 = vector.broadcast %144 : vector<8x1xf32> to vector<8x32xf32>
    %146 = arith.mulf %136, %145 : vector<8x32xf32>
    %147 = vector.broadcast %29 : vector<1x32xf32> to vector<8x32xf32>
    %148 = arith.mulf %146, %147 : vector<8x32xf32>
    %149 = vector.broadcast %30 : vector<1x32xf32> to vector<8x32xf32>
    %150 = arith.addf %148, %149 : vector<8x32xf32>
    %151 = vector.extract_strided_slice %24 {offsets = [0, 32], sizes = [32, 32], strides = [1, 1]} : vector<32x96xf32> to vector<32x32xf32>
    %cst_63 = arith.constant dense<0.000000e+00> : vector<8x32xf32>
    %152 = tpu.matmul %150, %151, %cst_63 {dimension_numbers = #tpu.dot_dimension_numbers<[1], [0], [0], [1], [0, 0, 1, 1], [], []>} : vector<8x32xf32>, vector<32x32xf32>, vector<8x32xf32> -> vector<8x32xf32>
    %153 = vector.broadcast %32 : vector<1x32xf32> to vector<8x32xf32>
    %154 = arith.addf %152, %153 : vector<8x32xf32>
    %cst_64 = arith.constant 5.000000e-01 : f32
    %155 = vector.broadcast %cst_64 : f32 to vector<8x32xf32>
    %156 = arith.mulf %155, %154 : vector<8x32xf32>
    %cst_65 = arith.constant 0.707106769 : f32
    %157 = vector.broadcast %cst_65 : f32 to vector<8x32xf32>
    %158 = arith.mulf %154, %157 : vector<8x32xf32>
    %159 = math.absf %158 : vector<8x32xf32>
    %cst_66 = arith.constant 0.327591091 : f32
    %160 = vector.broadcast %cst_66 : f32 to vector<8x32xf32>
    %161 = arith.mulf %160, %159 : vector<8x32xf32>
    %cst_67 = arith.constant 1.000000e+00 : f32
    %162 = vector.broadcast %cst_67 : f32 to vector<8x32xf32>
    %163 = arith.addf %162, %161 : vector<8x32xf32>
    %cst_68 = arith.constant 1.000000e+00 : f32
    %164 = vector.broadcast %cst_68 : f32 to vector<8x32xf32>
    %165 = arith.divf %164, %163 : vector<8x32xf32>
    %cst_69 = arith.constant 1.06140542 : f32
    %166 = vector.broadcast %cst_69 : f32 to vector<8x32xf32>
    %167 = arith.mulf %166, %165 : vector<8x32xf32>
    %cst_70 = arith.constant 1.45315206 : f32
    %168 = vector.broadcast %cst_70 : f32 to vector<8x32xf32>
    %169 = arith.subf %167, %168 : vector<8x32xf32>
    %170 = arith.mulf %169, %165 : vector<8x32xf32>
    %cst_71 = arith.constant 1.42141378 : f32
    %171 = vector.broadcast %cst_71 : f32 to vector<8x32xf32>
    %172 = arith.addf %170, %171 : vector<8x32xf32>
    %173 = arith.mulf %172, %165 : vector<8x32xf32>
    %cst_72 = arith.constant 0.284496725 : f32
    %174 = vector.broadcast %cst_72 : f32 to vector<8x32xf32>
    %175 = arith.subf %173, %174 : vector<8x32xf32>
    %176 = arith.mulf %175, %165 : vector<8x32xf32>
    %cst_73 = arith.constant 0.254829586 : f32
    %177 = vector.broadcast %cst_73 : f32 to vector<8x32xf32>
    %178 = arith.addf %176, %177 : vector<8x32xf32>
    %179 = arith.mulf %178, %165 : vector<8x32xf32>
    %cst_74 = arith.constant 0.000000e+00 : f32
    %180 = vector.broadcast %cst_74 : f32 to vector<8x32xf32>
    %181 = arith.subf %180, %159 : vector<8x32xf32>
    %182 = arith.mulf %181, %159 : vector<8x32xf32>
    %183 = math.exp %182 : vector<8x32xf32>
    %184 = arith.mulf %179, %183 : vector<8x32xf32>
    %cst_75 = arith.constant 1.000000e+00 : f32
    %185 = vector.broadcast %cst_75 : f32 to vector<8x32xf32>
    %186 = arith.subf %185, %184 : vector<8x32xf32>
    %cst_76 = arith.constant 0.000000e+00 : f32
    %187 = vector.broadcast %cst_76 : f32 to vector<8x32xf32>
    %188 = arith.cmpf olt, %158, %187 : vector<8x32xf32>
    %cst_77 = arith.constant 0.000000e+00 : f32
    %189 = vector.broadcast %cst_77 : f32 to vector<8x32xf32>
    %190 = arith.subf %189, %186 : vector<8x32xf32>
    %191 = arith.select %188, %190, %186 : vector<8x32xi1>, vector<8x32xf32>
    %cst_78 = arith.constant 1.000000e+00 : f32
    %192 = vector.broadcast %cst_78 : f32 to vector<8x32xf32>
    %193 = arith.addf %192, %191 : vector<8x32xf32>
    %194 = arith.mulf %156, %193 : vector<8x32xf32>
    %195 = vector.extract_strided_slice %24 {offsets = [0, 64], sizes = [32, 32], strides = [1, 1]} : vector<32x96xf32> to vector<32x32xf32>
    %cst_79 = arith.constant dense<0.000000e+00> : vector<8x32xf32>
    %196 = tpu.matmul %194, %195, %cst_79 {dimension_numbers = #tpu.dot_dimension_numbers<[1], [0], [0], [1], [0, 0, 1, 1], [], []>} : vector<8x32xf32>, vector<32x32xf32>, vector<8x32xf32> -> vector<8x32xf32>
    %197 = vector.broadcast %33 : vector<1x32xf32> to vector<8x32xf32>
    %198 = arith.addf %196, %197 : vector<8x32xf32>
    %199 = arith.addf %130, %198 : vector<8x32xf32>
    %c1_80 = arith.constant 1 : index
    %c0_81 = arith.constant 0 : index
    %c0_82 = arith.constant 0 : index
    %200 = vector.load %arg8[%c1_80, %c0_81, %c0_82] : memref<2x32x96xf32, #tpu.memory_space<vmem>>, vector<1x32x96xf32>
    %201 = vector.shape_cast %200 : vector<1x32x96xf32> to vector<32x96xf32>
    %c1_83 = arith.constant 1 : index
    %c0_84 = arith.constant 0 : index
    %c0_85 = arith.constant 0 : index
    %202 = vector.load %arg9[%c1_83, %c0_84, %c0_85] : memref<2x8x32xf32, #tpu.memory_space<vmem>>, vector<1x8x32xf32>
    %203 = vector.shape_cast %202 : vector<1x8x32xf32> to vector<8x32xf32>
    %204 = vector.extract_strided_slice %203 {offsets = [0, 0], sizes = [1, 32], strides = [1, 1]} : vector<8x32xf32> to vector<1x32xf32>
    %205 = vector.extract_strided_slice %203 {offsets = [1, 0], sizes = [1, 32], strides = [1, 1]} : vector<8x32xf32> to vector<1x32xf32>
    %206 = vector.extract_strided_slice %203 {offsets = [2, 0], sizes = [1, 32], strides = [1, 1]} : vector<8x32xf32> to vector<1x32xf32>
    %207 = vector.extract_strided_slice %203 {offsets = [3, 0], sizes = [1, 32], strides = [1, 1]} : vector<8x32xf32> to vector<1x32xf32>
    %208 = vector.extract_strided_slice %203 {offsets = [4, 0], sizes = [1, 32], strides = [1, 1]} : vector<8x32xf32> to vector<1x32xf32>
    %209 = vector.extract_strided_slice %203 {offsets = [5, 0], sizes = [1, 32], strides = [1, 1]} : vector<8x32xf32> to vector<1x32xf32>
    %210 = vector.extract_strided_slice %203 {offsets = [6, 0], sizes = [1, 32], strides = [1, 1]} : vector<8x32xf32> to vector<1x32xf32>
    %cst_86 = arith.constant dense<0.000000e+00> : vector<8xf32>
    %211 = vector.multi_reduction <add>, %199, %cst_86 [1] : vector<8x32xf32> to vector<8xf32>
    %212 = vector.shape_cast %211 : vector<8xf32> to vector<8x1xf32>
    %cst_87 = arith.constant 3.200000e+01 : f32
    %213 = vector.broadcast %cst_87 : f32 to vector<8x1xf32>
    %214 = arith.divf %212, %213 : vector<8x1xf32>
    %215 = vector.broadcast %214 : vector<8x1xf32> to vector<8x32xf32>
    %216 = arith.subf %199, %215 : vector<8x32xf32>
    %217 = arith.mulf %216, %216 : vector<8x32xf32>
    %cst_88 = arith.constant dense<0.000000e+00> : vector<8xf32>
    %218 = vector.multi_reduction <add>, %217, %cst_88 [1] : vector<8x32xf32> to vector<8xf32>
    %219 = vector.shape_cast %218 : vector<8xf32> to vector<8x1xf32>
    %cst_89 = arith.constant 3.200000e+01 : f32
    %220 = vector.broadcast %cst_89 : f32 to vector<8x1xf32>
    %221 = arith.divf %219, %220 : vector<8x1xf32>
    %cst_90 = arith.constant 9.99999974E-6 : f32
    %222 = vector.broadcast %cst_90 : f32 to vector<8x1xf32>
    %223 = arith.addf %221, %222 : vector<8x1xf32>
    %224 = math.rsqrt %223 : vector<8x1xf32>
    %225 = vector.broadcast %224 : vector<8x1xf32> to vector<8x32xf32>
    %226 = arith.mulf %216, %225 : vector<8x32xf32>
    %227 = vector.broadcast %204 : vector<1x32xf32> to vector<8x32xf32>
    %228 = arith.mulf %226, %227 : vector<8x32xf32>
    %229 = vector.broadcast %205 : vector<1x32xf32> to vector<8x32xf32>
    %230 = arith.addf %228, %229 : vector<8x32xf32>
    %c1_91 = arith.constant 1 : index
    %c0_92 = arith.constant 0 : index
    %c0_93 = arith.constant 0 : index
    %231 = vector.load %arg6[%c1_91, %c0_92, %c0_93] : memref<2x32x96xf32, #tpu.memory_space<vmem>>, vector<1x32x96xf32>
    %232 = vector.shape_cast %231 : vector<1x32x96xf32> to vector<32x96xf32>
    %cst_94 = arith.constant dense<0.000000e+00> : vector<8x96xf32>
    %233 = tpu.matmul %230, %232, %cst_94 {dimension_numbers = #tpu.dot_dimension_numbers<[1], [0], [0], [1], [0, 0, 1, 1], [], []>} : vector<8x32xf32>, vector<32x96xf32>, vector<8x96xf32> -> vector<8x96xf32>
    %c1_95 = arith.constant 1 : index
    %c0_96 = arith.constant 0 : index
    %c0_97 = arith.constant 0 : index
    %234 = vector.load %arg7[%c1_95, %c0_96, %c0_97] : memref<2x1x96xf32, #tpu.memory_space<vmem>>, vector<1x1x96xf32>
    %235 = vector.shape_cast %234 : vector<1x1x96xf32> to vector<1x96xf32>
    %236 = vector.broadcast %235 : vector<1x96xf32> to vector<8x96xf32>
    %237 = arith.addf %233, %236 : vector<8x96xf32>
    %238 = vector.extract_strided_slice %237 {offsets = [0, 0], sizes = [8, 8], strides = [1, 1]} : vector<8x96xf32> to vector<8x8xf32>
    %239 = vector.extract_strided_slice %237 {offsets = [0, 32], sizes = [8, 8], strides = [1, 1]} : vector<8x96xf32> to vector<8x8xf32>
    %240 = vector.extract_strided_slice %237 {offsets = [0, 64], sizes = [8, 8], strides = [1, 1]} : vector<8x96xf32> to vector<8x8xf32>
    %cst_98 = arith.constant dense<0.000000e+00> : vector<8x8xf32>
    %241 = tpu.matmul %238, %239, %cst_98 {dimension_numbers = #tpu.dot_dimension_numbers<[1], [1], [0], [0], [0, 0, 1, 0], [], []>} : vector<8x8xf32>, vector<8x8xf32>, vector<8x8xf32> -> vector<8x8xf32>
    %cst_99 = arith.constant 6.000000e-01 : f32
    %242 = vector.broadcast %cst_99 : f32 to vector<8x8xf32>
    %243 = arith.mulf %241, %242 : vector<8x8xf32>
    %cst_100 = arith.constant dense<0xFF800000> : vector<8xf32>
    %244 = vector.multi_reduction <maximumf>, %243, %cst_100 [1] : vector<8x8xf32> to vector<8xf32>
    %245 = vector.shape_cast %244 : vector<8xf32> to vector<8x1xf32>
    %246 = vector.broadcast %245 : vector<8x1xf32> to vector<8x8xf32>
    %247 = arith.subf %243, %246 : vector<8x8xf32>
    %248 = math.exp %247 : vector<8x8xf32>
    %cst_101 = arith.constant dense<0.000000e+00> : vector<8xf32>
    %249 = vector.multi_reduction <add>, %248, %cst_101 [1] : vector<8x8xf32> to vector<8xf32>
    %250 = vector.shape_cast %249 : vector<8xf32> to vector<8x1xf32>
    %251 = vector.broadcast %250 : vector<8x1xf32> to vector<8x8xf32>
    %252 = arith.divf %248, %251 : vector<8x8xf32>
    %cst_102 = arith.constant dense<0.000000e+00> : vector<8x8xf32>
    %253 = tpu.matmul %252, %240, %cst_102 {dimension_numbers = #tpu.dot_dimension_numbers<[1], [0], [0], [1], [0, 0, 1, 1], [], []>} : vector<8x8xf32>, vector<8x8xf32>, vector<8x8xf32> -> vector<8x8xf32>
    %254 = vector.extract_strided_slice %237 {offsets = [0, 8], sizes = [8, 8], strides = [1, 1]} : vector<8x96xf32> to vector<8x8xf32>
    %255 = vector.extract_strided_slice %237 {offsets = [0, 40], sizes = [8, 8], strides = [1, 1]} : vector<8x96xf32> to vector<8x8xf32>
    %256 = vector.extract_strided_slice %237 {offsets = [0, 72], sizes = [8, 8], strides = [1, 1]} : vector<8x96xf32> to vector<8x8xf32>
    %cst_103 = arith.constant dense<0.000000e+00> : vector<8x8xf32>
    %257 = tpu.matmul %254, %255, %cst_103 {dimension_numbers = #tpu.dot_dimension_numbers<[1], [1], [0], [0], [0, 0, 1, 0], [], []>} : vector<8x8xf32>, vector<8x8xf32>, vector<8x8xf32> -> vector<8x8xf32>
    %cst_104 = arith.constant 6.000000e-01 : f32
    %258 = vector.broadcast %cst_104 : f32 to vector<8x8xf32>
    %259 = arith.mulf %257, %258 : vector<8x8xf32>
    %cst_105 = arith.constant dense<0xFF800000> : vector<8xf32>
    %260 = vector.multi_reduction <maximumf>, %259, %cst_105 [1] : vector<8x8xf32> to vector<8xf32>
    %261 = vector.shape_cast %260 : vector<8xf32> to vector<8x1xf32>
    %262 = vector.broadcast %261 : vector<8x1xf32> to vector<8x8xf32>
    %263 = arith.subf %259, %262 : vector<8x8xf32>
    %264 = math.exp %263 : vector<8x8xf32>
    %cst_106 = arith.constant dense<0.000000e+00> : vector<8xf32>
    %265 = vector.multi_reduction <add>, %264, %cst_106 [1] : vector<8x8xf32> to vector<8xf32>
    %266 = vector.shape_cast %265 : vector<8xf32> to vector<8x1xf32>
    %267 = vector.broadcast %266 : vector<8x1xf32> to vector<8x8xf32>
    %268 = arith.divf %264, %267 : vector<8x8xf32>
    %cst_107 = arith.constant dense<0.000000e+00> : vector<8x8xf32>
    %269 = tpu.matmul %268, %256, %cst_107 {dimension_numbers = #tpu.dot_dimension_numbers<[1], [0], [0], [1], [0, 0, 1, 1], [], []>} : vector<8x8xf32>, vector<8x8xf32>, vector<8x8xf32> -> vector<8x8xf32>
    %270 = vector.extract_strided_slice %237 {offsets = [0, 16], sizes = [8, 8], strides = [1, 1]} : vector<8x96xf32> to vector<8x8xf32>
    %271 = vector.extract_strided_slice %237 {offsets = [0, 48], sizes = [8, 8], strides = [1, 1]} : vector<8x96xf32> to vector<8x8xf32>
    %272 = vector.extract_strided_slice %237 {offsets = [0, 80], sizes = [8, 8], strides = [1, 1]} : vector<8x96xf32> to vector<8x8xf32>
    %cst_108 = arith.constant dense<0.000000e+00> : vector<8x8xf32>
    %273 = tpu.matmul %270, %271, %cst_108 {dimension_numbers = #tpu.dot_dimension_numbers<[1], [1], [0], [0], [0, 0, 1, 0], [], []>} : vector<8x8xf32>, vector<8x8xf32>, vector<8x8xf32> -> vector<8x8xf32>
    %cst_109 = arith.constant 6.000000e-01 : f32
    %274 = vector.broadcast %cst_109 : f32 to vector<8x8xf32>
    %275 = arith.mulf %273, %274 : vector<8x8xf32>
    %cst_110 = arith.constant dense<0xFF800000> : vector<8xf32>
    %276 = vector.multi_reduction <maximumf>, %275, %cst_110 [1] : vector<8x8xf32> to vector<8xf32>
    %277 = vector.shape_cast %276 : vector<8xf32> to vector<8x1xf32>
    %278 = vector.broadcast %277 : vector<8x1xf32> to vector<8x8xf32>
    %279 = arith.subf %275, %278 : vector<8x8xf32>
    %280 = math.exp %279 : vector<8x8xf32>
    %cst_111 = arith.constant dense<0.000000e+00> : vector<8xf32>
    %281 = vector.multi_reduction <add>, %280, %cst_111 [1] : vector<8x8xf32> to vector<8xf32>
    %282 = vector.shape_cast %281 : vector<8xf32> to vector<8x1xf32>
    %283 = vector.broadcast %282 : vector<8x1xf32> to vector<8x8xf32>
    %284 = arith.divf %280, %283 : vector<8x8xf32>
    %cst_112 = arith.constant dense<0.000000e+00> : vector<8x8xf32>
    %285 = tpu.matmul %284, %272, %cst_112 {dimension_numbers = #tpu.dot_dimension_numbers<[1], [0], [0], [1], [0, 0, 1, 1], [], []>} : vector<8x8xf32>, vector<8x8xf32>, vector<8x8xf32> -> vector<8x8xf32>
    %286 = vector.extract_strided_slice %237 {offsets = [0, 24], sizes = [8, 8], strides = [1, 1]} : vector<8x96xf32> to vector<8x8xf32>
    %287 = vector.extract_strided_slice %237 {offsets = [0, 56], sizes = [8, 8], strides = [1, 1]} : vector<8x96xf32> to vector<8x8xf32>
    %288 = vector.extract_strided_slice %237 {offsets = [0, 88], sizes = [8, 8], strides = [1, 1]} : vector<8x96xf32> to vector<8x8xf32>
    %cst_113 = arith.constant dense<0.000000e+00> : vector<8x8xf32>
    %289 = tpu.matmul %286, %287, %cst_113 {dimension_numbers = #tpu.dot_dimension_numbers<[1], [1], [0], [0], [0, 0, 1, 0], [], []>} : vector<8x8xf32>, vector<8x8xf32>, vector<8x8xf32> -> vector<8x8xf32>
    %cst_114 = arith.constant 6.000000e-01 : f32
    %290 = vector.broadcast %cst_114 : f32 to vector<8x8xf32>
    %291 = arith.mulf %289, %290 : vector<8x8xf32>
    %cst_115 = arith.constant dense<0xFF800000> : vector<8xf32>
    %292 = vector.multi_reduction <maximumf>, %291, %cst_115 [1] : vector<8x8xf32> to vector<8xf32>
    %293 = vector.shape_cast %292 : vector<8xf32> to vector<8x1xf32>
    %294 = vector.broadcast %293 : vector<8x1xf32> to vector<8x8xf32>
    %295 = arith.subf %291, %294 : vector<8x8xf32>
    %296 = math.exp %295 : vector<8x8xf32>
    %cst_116 = arith.constant dense<0.000000e+00> : vector<8xf32>
    %297 = vector.multi_reduction <add>, %296, %cst_116 [1] : vector<8x8xf32> to vector<8xf32>
    %298 = vector.shape_cast %297 : vector<8xf32> to vector<8x1xf32>
    %299 = vector.broadcast %298 : vector<8x1xf32> to vector<8x8xf32>
    %300 = arith.divf %296, %299 : vector<8x8xf32>
    %cst_117 = arith.constant dense<0.000000e+00> : vector<8x8xf32>
    %301 = tpu.matmul %300, %288, %cst_117 {dimension_numbers = #tpu.dot_dimension_numbers<[1], [0], [0], [1], [0, 0, 1, 1], [], []>} : vector<8x8xf32>, vector<8x8xf32>, vector<8x8xf32> -> vector<8x8xf32>
    %302 = tpu.concatenate %253, %269, %285, %301 in 1 : vector<8x8xf32>, vector<8x8xf32>, vector<8x8xf32>, vector<8x8xf32> -> vector<8x32xf32>
    %303 = vector.extract_strided_slice %201 {offsets = [0, 0], sizes = [32, 32], strides = [1, 1]} : vector<32x96xf32> to vector<32x32xf32>
    %cst_118 = arith.constant dense<0.000000e+00> : vector<8x32xf32>
    %304 = tpu.matmul %302, %303, %cst_118 {dimension_numbers = #tpu.dot_dimension_numbers<[1], [0], [0], [1], [0, 0, 1, 1], [], []>} : vector<8x32xf32>, vector<32x32xf32>, vector<8x32xf32> -> vector<8x32xf32>
    %305 = vector.broadcast %208 : vector<1x32xf32> to vector<8x32xf32>
    %306 = arith.addf %304, %305 : vector<8x32xf32>
    %307 = arith.addf %199, %306 : vector<8x32xf32>
    %cst_119 = arith.constant dense<0.000000e+00> : vector<8xf32>
    %308 = vector.multi_reduction <add>, %307, %cst_119 [1] : vector<8x32xf32> to vector<8xf32>
    %309 = vector.shape_cast %308 : vector<8xf32> to vector<8x1xf32>
    %cst_120 = arith.constant 3.200000e+01 : f32
    %310 = vector.broadcast %cst_120 : f32 to vector<8x1xf32>
    %311 = arith.divf %309, %310 : vector<8x1xf32>
    %312 = vector.broadcast %311 : vector<8x1xf32> to vector<8x32xf32>
    %313 = arith.subf %307, %312 : vector<8x32xf32>
    %314 = arith.mulf %313, %313 : vector<8x32xf32>
    %cst_121 = arith.constant dense<0.000000e+00> : vector<8xf32>
    %315 = vector.multi_reduction <add>, %314, %cst_121 [1] : vector<8x32xf32> to vector<8xf32>
    %316 = vector.shape_cast %315 : vector<8xf32> to vector<8x1xf32>
    %cst_122 = arith.constant 3.200000e+01 : f32
    %317 = vector.broadcast %cst_122 : f32 to vector<8x1xf32>
    %318 = arith.divf %316, %317 : vector<8x1xf32>
    %cst_123 = arith.constant 9.99999974E-6 : f32
    %319 = vector.broadcast %cst_123 : f32 to vector<8x1xf32>
    %320 = arith.addf %318, %319 : vector<8x1xf32>
    %321 = math.rsqrt %320 : vector<8x1xf32>
    %322 = vector.broadcast %321 : vector<8x1xf32> to vector<8x32xf32>
    %323 = arith.mulf %313, %322 : vector<8x32xf32>
    %324 = vector.broadcast %206 : vector<1x32xf32> to vector<8x32xf32>
    %325 = arith.mulf %323, %324 : vector<8x32xf32>
    %326 = vector.broadcast %207 : vector<1x32xf32> to vector<8x32xf32>
    %327 = arith.addf %325, %326 : vector<8x32xf32>
    %328 = vector.extract_strided_slice %201 {offsets = [0, 32], sizes = [32, 32], strides = [1, 1]} : vector<32x96xf32> to vector<32x32xf32>
    %cst_124 = arith.constant dense<0.000000e+00> : vector<8x32xf32>
    %329 = tpu.matmul %327, %328, %cst_124 {dimension_numbers = #tpu.dot_dimension_numbers<[1], [0], [0], [1], [0, 0, 1, 1], [], []>} : vector<8x32xf32>, vector<32x32xf32>, vector<8x32xf32> -> vector<8x32xf32>
    %330 = vector.broadcast %209 : vector<1x32xf32> to vector<8x32xf32>
    %331 = arith.addf %329, %330 : vector<8x32xf32>
    %cst_125 = arith.constant 5.000000e-01 : f32
    %332 = vector.broadcast %cst_125 : f32 to vector<8x32xf32>
    %333 = arith.mulf %332, %331 : vector<8x32xf32>
    %cst_126 = arith.constant 0.707106769 : f32
    %334 = vector.broadcast %cst_126 : f32 to vector<8x32xf32>
    %335 = arith.mulf %331, %334 : vector<8x32xf32>
    %336 = math.absf %335 : vector<8x32xf32>
    %cst_127 = arith.constant 0.327591091 : f32
    %337 = vector.broadcast %cst_127 : f32 to vector<8x32xf32>
    %338 = arith.mulf %337, %336 : vector<8x32xf32>
    %cst_128 = arith.constant 1.000000e+00 : f32
    %339 = vector.broadcast %cst_128 : f32 to vector<8x32xf32>
    %340 = arith.addf %339, %338 : vector<8x32xf32>
    %cst_129 = arith.constant 1.000000e+00 : f32
    %341 = vector.broadcast %cst_129 : f32 to vector<8x32xf32>
    %342 = arith.divf %341, %340 : vector<8x32xf32>
    %cst_130 = arith.constant 1.06140542 : f32
    %343 = vector.broadcast %cst_130 : f32 to vector<8x32xf32>
    %344 = arith.mulf %343, %342 : vector<8x32xf32>
    %cst_131 = arith.constant 1.45315206 : f32
    %345 = vector.broadcast %cst_131 : f32 to vector<8x32xf32>
    %346 = arith.subf %344, %345 : vector<8x32xf32>
    %347 = arith.mulf %346, %342 : vector<8x32xf32>
    %cst_132 = arith.constant 1.42141378 : f32
    %348 = vector.broadcast %cst_132 : f32 to vector<8x32xf32>
    %349 = arith.addf %347, %348 : vector<8x32xf32>
    %350 = arith.mulf %349, %342 : vector<8x32xf32>
    %cst_133 = arith.constant 0.284496725 : f32
    %351 = vector.broadcast %cst_133 : f32 to vector<8x32xf32>
    %352 = arith.subf %350, %351 : vector<8x32xf32>
    %353 = arith.mulf %352, %342 : vector<8x32xf32>
    %cst_134 = arith.constant 0.254829586 : f32
    %354 = vector.broadcast %cst_134 : f32 to vector<8x32xf32>
    %355 = arith.addf %353, %354 : vector<8x32xf32>
    %356 = arith.mulf %355, %342 : vector<8x32xf32>
    %cst_135 = arith.constant 0.000000e+00 : f32
    %357 = vector.broadcast %cst_135 : f32 to vector<8x32xf32>
    %358 = arith.subf %357, %336 : vector<8x32xf32>
    %359 = arith.mulf %358, %336 : vector<8x32xf32>
    %360 = math.exp %359 : vector<8x32xf32>
    %361 = arith.mulf %356, %360 : vector<8x32xf32>
    %cst_136 = arith.constant 1.000000e+00 : f32
    %362 = vector.broadcast %cst_136 : f32 to vector<8x32xf32>
    %363 = arith.subf %362, %361 : vector<8x32xf32>
    %cst_137 = arith.constant 0.000000e+00 : f32
    %364 = vector.broadcast %cst_137 : f32 to vector<8x32xf32>
    %365 = arith.cmpf olt, %335, %364 : vector<8x32xf32>
    %cst_138 = arith.constant 0.000000e+00 : f32
    %366 = vector.broadcast %cst_138 : f32 to vector<8x32xf32>
    %367 = arith.subf %366, %363 : vector<8x32xf32>
    %368 = arith.select %365, %367, %363 : vector<8x32xi1>, vector<8x32xf32>
    %cst_139 = arith.constant 1.000000e+00 : f32
    %369 = vector.broadcast %cst_139 : f32 to vector<8x32xf32>
    %370 = arith.addf %369, %368 : vector<8x32xf32>
    %371 = arith.mulf %333, %370 : vector<8x32xf32>
    %372 = vector.extract_strided_slice %201 {offsets = [0, 64], sizes = [32, 32], strides = [1, 1]} : vector<32x96xf32> to vector<32x32xf32>
    %cst_140 = arith.constant dense<0.000000e+00> : vector<8x32xf32>
    %373 = tpu.matmul %371, %372, %cst_140 {dimension_numbers = #tpu.dot_dimension_numbers<[1], [0], [0], [1], [0, 0, 1, 1], [], []>} : vector<8x32xf32>, vector<32x32xf32>, vector<8x32xf32> -> vector<8x32xf32>
    %374 = vector.broadcast %210 : vector<1x32xf32> to vector<8x32xf32>
    %375 = arith.addf %373, %374 : vector<8x32xf32>
    %376 = arith.addf %307, %375 : vector<8x32xf32>
    %377 = tpu.concatenate %22, %199, %376 in 0 : vector<8x32xf32>, vector<8x32xf32>, vector<8x32xf32> -> vector<24x32xf32>
    %cst_141 = arith.constant 0.000000e+00 : f32
    %378 = vector.broadcast %cst_141 : f32 to vector<24x96xf32>
    %379 = tpu.concatenate %377, %378 in 1 : vector<24x32xf32>, vector<24x96xf32> -> vector<24x128xf32>
    %c0_142 = arith.constant 0 : index
    %c0_143 = arith.constant 0 : index
    %c0_144 = arith.constant 0 : index
    %380 = vector.load %arg4[%c0_142, %c0_143, %c0_144] : memref<3x128x128xf32, #tpu.memory_space<vmem>>, vector<1x128x128xf32>
    %381 = vector.shape_cast %380 : vector<1x128x128xf32> to vector<128x128xf32>
    %cst_145 = arith.constant dense<0.000000e+00> : vector<24x128xf32>
    %382 = tpu.matmul %379, %381, %cst_145 {dimension_numbers = #tpu.dot_dimension_numbers<[1], [0], [0], [1], [0, 0, 1, 1], [], []>} : vector<24x128xf32>, vector<128x128xf32>, vector<24x128xf32> -> vector<24x128xf32>
    %c0_146 = arith.constant 0 : index
    %c0_147 = arith.constant 0 : index
    %c0_148 = arith.constant 0 : index
    %383 = vector.load %arg5[%c0_146, %c0_147, %c0_148] : memref<3x1x128xf32, #tpu.memory_space<vmem>>, vector<1x1x128xf32>
    %384 = vector.shape_cast %383 : vector<1x1x128xf32> to vector<1x128xf32>
    %385 = vector.broadcast %384 : vector<1x128xf32> to vector<24x128xf32>
    %386 = arith.addf %382, %385 : vector<24x128xf32>
    %c1_149 = arith.constant 1 : index
    %c0_150 = arith.constant 0 : index
    %c0_151 = arith.constant 0 : index
    %387 = vector.load %arg4[%c1_149, %c0_150, %c0_151] : memref<3x128x128xf32, #tpu.memory_space<vmem>>, vector<1x128x128xf32>
    %388 = vector.shape_cast %387 : vector<1x128x128xf32> to vector<128x128xf32>
    %cst_152 = arith.constant dense<0.000000e+00> : vector<24x128xf32>
    %389 = tpu.matmul %386, %388, %cst_152 {dimension_numbers = #tpu.dot_dimension_numbers<[1], [0], [0], [1], [0, 0, 1, 1], [], []>} : vector<24x128xf32>, vector<128x128xf32>, vector<24x128xf32> -> vector<24x128xf32>
    %c1_153 = arith.constant 1 : index
    %c0_154 = arith.constant 0 : index
    %c0_155 = arith.constant 0 : index
    %390 = vector.load %arg5[%c1_153, %c0_154, %c0_155] : memref<3x1x128xf32, #tpu.memory_space<vmem>>, vector<1x1x128xf32>
    %391 = vector.shape_cast %390 : vector<1x1x128xf32> to vector<1x128xf32>
    %392 = vector.broadcast %391 : vector<1x128xf32> to vector<24x128xf32>
    %393 = arith.addf %389, %392 : vector<24x128xf32>
    %c2_156 = arith.constant 2 : index
    %c0_157 = arith.constant 0 : index
    %c0_158 = arith.constant 0 : index
    %394 = vector.load %arg4[%c2_156, %c0_157, %c0_158] : memref<3x128x128xf32, #tpu.memory_space<vmem>>, vector<1x128x128xf32>
    %395 = vector.shape_cast %394 : vector<1x128x128xf32> to vector<128x128xf32>
    %cst_159 = arith.constant dense<0.000000e+00> : vector<24x128xf32>
    %396 = tpu.matmul %393, %395, %cst_159 {dimension_numbers = #tpu.dot_dimension_numbers<[1], [0], [0], [1], [0, 0, 1, 1], [], []>} : vector<24x128xf32>, vector<128x128xf32>, vector<24x128xf32> -> vector<24x128xf32>
    %c2_160 = arith.constant 2 : index
    %c0_161 = arith.constant 0 : index
    %c0_162 = arith.constant 0 : index
    %397 = vector.load %arg5[%c2_160, %c0_161, %c0_162] : memref<3x1x128xf32, #tpu.memory_space<vmem>>, vector<1x1x128xf32>
    %398 = vector.shape_cast %397 : vector<1x1x128xf32> to vector<1x128xf32>
    %399 = vector.broadcast %398 : vector<1x128xf32> to vector<24x128xf32>
    %400 = arith.addf %396, %399 : vector<24x128xf32>
    %c0_163 = arith.constant 0 : index
    %c0_164 = arith.constant 0 : index
    %401 = vector.load %arg10[%c0_163, %c0_164] : memref<24x128xf32, #tpu.memory_space<vmem>>, vector<24x128xf32>
    tpu.vector_store %arg10[%c0_163, %c0_164], %400 {strides = array<i32>} : memref<24x128xf32, #tpu.memory_space<vmem>>, vector<24x128xf32>,
    return
  }
  func.func @transform_0(%arg0: i32) -> (i32, i32) {
    %c0_i32 = arith.constant 0 : i32
    %c0_i32_0 = arith.constant 0 : i32
    return %arg0, %c0_i32 : i32, i32
  }
  func.func @transform_1(%arg0: i32) -> (i32, i32, i32) {
    %c0_i32 = arith.constant 0 : i32
    %c0_i32_0 = arith.constant 0 : i32
    %c0_i32_1 = arith.constant 0 : i32
    %c0_i32_2 = arith.constant 0 : i32
    return %c0_i32, %c0_i32_0, %c0_i32_1 : i32, i32, i32
  }
  func.func @transform_2(%arg0: i32) -> (i32, i32, i32) {
    %c0_i32 = arith.constant 0 : i32
    %c0_i32_0 = arith.constant 0 : i32
    %c0_i32_1 = arith.constant 0 : i32
    %c0_i32_2 = arith.constant 0 : i32
    return %c0_i32, %c0_i32_0, %c0_i32_1 : i32, i32, i32
  }
  func.func @transform_3(%arg0: i32) -> (i32, i32, i32) {
    %c0_i32 = arith.constant 0 : i32
    %c0_i32_0 = arith.constant 0 : i32
    %c0_i32_1 = arith.constant 0 : i32
    %c0_i32_2 = arith.constant 0 : i32
    return %c0_i32, %c0_i32_0, %c0_i32_1 : i32, i32, i32
  }
  func.func @transform_4(%arg0: i32) -> (i32, i32, i32) {
    %c0_i32 = arith.constant 0 : i32
    %c0_i32_0 = arith.constant 0 : i32
    %c0_i32_1 = arith.constant 0 : i32
    %c0_i32_2 = arith.constant 0 : i32
    return %c0_i32, %c0_i32_0, %c0_i32_1 : i32, i32, i32
  }
  func.func @transform_5(%arg0: i32) -> (i32, i32, i32) {
    %c0_i32 = arith.constant 0 : i32
    %c0_i32_0 = arith.constant 0 : i32
    %c0_i32_1 = arith.constant 0 : i32
    %c0_i32_2 = arith.constant 0 : i32
    return %c0_i32, %c0_i32_0, %c0_i32_1 : i32, i32, i32
  }
  func.func @transform_6(%arg0: i32) -> (i32, i32, i32) {
    %c0_i32 = arith.constant 0 : i32
    %c0_i32_0 = arith.constant 0 : i32
    %c0_i32_1 = arith.constant 0 : i32
    %c0_i32_2 = arith.constant 0 : i32
    return %c0_i32, %c0_i32_0, %c0_i32_1 : i32, i32, i32
  }
  func.func @transform_7(%arg0: i32) -> (i32, i32, i32) {
    %c0_i32 = arith.constant 0 : i32
    %c0_i32_0 = arith.constant 0 : i32
    %c0_i32_1 = arith.constant 0 : i32
    %c0_i32_2 = arith.constant 0 : i32
    return %c0_i32, %c0_i32_0, %c0_i32_1 : i32, i32, i32
  }
  func.func @transform_8(%arg0: i32) -> (i32, i32, i32) {
    %c0_i32 = arith.constant 0 : i32
    %c0_i32_0 = arith.constant 0 : i32
    %c0_i32_1 = arith.constant 0 : i32
    %c0_i32_2 = arith.constant 0 : i32
    return %c0_i32, %c0_i32_0, %c0_i32_1 : i32, i32, i32
  }
  func.func @transform_9(%arg0: i32) -> (i32, i32) {
    %c0_i32 = arith.constant 0 : i32
    %c0_i32_0 = arith.constant 0 : i32
    return %arg0, %c0_i32 : i32, i32
  }
}

</mosaic_0001>

<bundles_post_ra>
// kernel: jr_transformer_forward.1
= control target key start
LH: loop header
LB: loop body
LE: loop exit
PB: predicated region body
PF: predicated region fallthrough
CT: control target
= control target key end

     0   :  { %s4289_s30 = smov 0   ;;  %s5043_s0 = inlined_call_operand.vmem [shape: f32[16,128], index: 0, kind: input, shape index: {}]   ;;  %s5044_s1 = inlined_call_operand.vmem [shape: f32[3,128,128], index: 1, kind: input, shape index: {}]   ;;  %s5045_s2 = inlined_call_operand.vmem [shape: f32[3,1,128], index: 2, kind: input, shape index: {}]   ;;  %s5046_s3 = inlined_call_operand.vmem [shape: f32[3,128,128], index: 3, kind: input, shape index: {}]   ;;  %s5047_s4 = inlined_call_operand.vmem [shape: f32[3,1,128], index: 4, kind: input, shape index: {}]   ;;  %s5048_s5 = inlined_call_operand.vmem [shape: f32[2,32,96], index: 5, kind: input, shape index: {}]   ;;  %s5049_s6 = inlined_call_operand.vmem [shape: f32[2,1,96], index: 6, kind: input, shape index: {}]   ;;  %s5050_s7 = inlined_call_operand.vmem [shape: f32[2,32,96], index: 7, kind: input, shape index: {}]   ;;  %s5051_s8 = inlined_call_operand.vmem [shape: f32[2,8,32], index: 8, kind: input, shape index: {}]   ;;  %s5052_s9 = inlined_call_operand.vmem [shape: f32[48,128], index: 9, kind: output, shape index: {}]  }
   0x1 LB: > { %s4295_s10 = sadd.s32 4294967295, %s4220_s30   ;;  %p3203_p0 = scmp.ge.s32.totalorder %s4220_s30, 1  ;;  %s4220_s30 = sphi %s4289_s30, %s19_s30  }
   0x2   : > { %p286_p1 = scmp.lt.s32.totalorder %s4220_s30, 3 }
   0x4   : > { %p287_p2 = pnand %p3203_p0, %p286_p1 }
   0x5   : > { %v332_v0 = vld [vmem:[%s5044_s1] sm:$0xff] (!%p287_p2)  ;;  %v333_v1 = vld [vmem:[%s5044_s1 + $0x8] sm:$0xff] (!%p287_p2)  ;;  %v334_v2 = vld [vmem:[%s5044_s1 + $0x10] sm:$0xff] (!%p287_p2)  ;;  %v4222_v3 = vmov (!%p287_p2), 0.0|0.0   ;;  %vm4223_vm0 = vmmov (!%p287_p2), 0   ;;  %v4224_v6 = vmov (!%p287_p2), 0.0  }
   0x6   : > { %290 = sbr.rel (%p287_p2) target bundleno = 7420 (0x1cfc), region = 56  ;;  %3909 = vmatprep.subr.bf16.mxu0 (!%p287_p2), %v4222_v3  ;;  %v3910_v4 = vpack.c.bf16 (!%p287_p2), %v333_v1, %v332_v0  ;;  %v335_v5 = vld [vmem:[%s5044_s1 + $0x18] sm:$0xff] (!%p287_p2)  ;;  %3545 = vmatprep.mubr.msk.f32.mxu0 (!%p287_p2), %vm4223_vm0, %v4224_v6  ;;  %v336_v8 = vld [vmem:[%s5044_s1 + $0x20] sm:$0xff] (!%p287_p2)  ;;  %v337_v9 = vld [vmem:[%s5044_s1 + $0x28] sm:$0xff] (!%p287_p2)  ;;  %p321_p3 = scmp.lt.s32.totalorder (!%p287_p2), %s4295_s10, 1  ;;  %vm620_vm1 = vcmask (!%p287_p2), 261120  }
   0x7   : > { %3933 = vmatprep.subr.bf16.mxu1 (!%p287_p2), %v4222_v3  ;;  %3580 = vmatprep.mubr.msk.f32.mxu1 (!%p287_p2), %vm4223_vm0, %v4224_v6  ;;  %v3913_v7 = vpack.c.bf16 (!%p287_p2), %v335_v5, %v334_v2  ;;  %v3207_v10 = vld [vmem:[%s5044_s1 + $0x80] sm:$0xff] (!%p287_p2)  ;;  %v3208_v11 = vld [vmem:[%s5044_s1 + $0x88] sm:$0xff] (!%p287_p2)  ;;  %v3209_v13 = vld [vmem:[%s5044_s1 + $0x90] sm:$0xff] (!%p287_p2)  ;;  %v3916_v15 = vpack.c.bf16 (!%p287_p2), %v337_v9, %v336_v8  ;;  %s4225_s16 = smov (!%p287_p2), 64   ;;  %s4226_s17 = smov (!%p287_p2), 96   ;;  %vm732_vm2 = vcmask (!%p287_p2), 64512  }
   0x8   : > { %3911 = vmatpush3.bf16.msra.mxu0 (!%p287_p2), %v3910_v4  ;;  %v3934_v12 = vpack.c.bf16 (!%p287_p2), %v3208_v11, %v3207_v10  ;;  %v3210_v14 = vld [vmem:[%s5044_s1 + $0x98] sm:$0xff] (!%p287_p2)  ;;  %v338_v16 = vld [vmem:[%s5044_s1 + $0x30] sm:$0xff] (!%p287_p2)  ;;  %v3211_v19 = vld [vmem:[%s5044_s1 + $0xa0] sm:$0xff] (!%p287_p2)  ;;  %s4228_s19 = smov (!%p287_p2), 120   ;;  %s4229_s20 = smov (!%p287_p2), 56   ;;  %vm1406_vm3 = vcmask (!%p287_p2), 130048  }
   0x9   : > { %3912 = vmatprep.subr.bf16.mxu0 (!%p287_p2), %v4222_v3  ;;  %v339_v17 = vld [vmem:[%s5044_s1 + $0x38] sm:$0xff] (!%p287_p2)  ;;  %v3937_v18 = vpack.c.bf16 (!%p287_p2), %v3210_v14, %v3209_v13  ;;  %v3212_v20 = vld [vmem:[%s5044_s1 + $0xa8] sm:$0xff] (!%p287_p2)  ;;  %v340_v22 = vld [vmem:[%s5044_s1 + $0x40] sm:$0xff] (!%p287_p2)  ;;  %s4231_s22 = smov (!%p287_p2), 112   ;;  %s4232_s23 = smov (!%p287_p2), 72   ;;  %vm1408_vm4 = vcmask (!%p287_p2), 195584  }
   0xa   : > { %3935 = vmatpush3.bf16.msra.mxu1 (!%p287_p2), %v3934_v12  ;;  %v3919_v21 = vpack.c.bf16 (!%p287_p2), %v339_v17, %v338_v16  ;;  %v341_v23 = vld [vmem:[%s5044_s1 + $0x48] sm:$0xff] (!%p287_p2)  ;;  %v3940_v24 = vpack.c.bf16 (!%p287_p2), %v3212_v20, %v3211_v19  ;;  %v3213_v25 = vld [vmem:[%s5044_s1 + $0xb0] sm:$0xff] (!%p287_p2)  ;;  %v3214_v26 = vld [vmem:[%s5044_s1 + $0xb8] sm:$0xff] (!%p287_p2)  ;;  %s4233_s24 = smov (!%p287_p2), 104   ;;  %s4234_s25 = smov (!%p287_p2), 40  }
   0xb   : > { %3936 = vmatprep.subr.bf16.mxu1 (!%p287_p2), %v4222_v3  ;;  %v3922_v27 = vpack.c.bf16 (!%p287_p2), %v341_v23, %v340_v22  ;;  %v342_v28 = vld [vmem:[%s5044_s1 + $0x50] sm:$0xff] (!%p287_p2)  ;;  %v343_v29 = vld [vmem:[%s5044_s1 + $0x58] sm:$0xff] (!%p287_p2)  ;;  %v3943_v30 = vpack.c.bf16 (!%p287_p2), %v3214_v26, %v3213_v25  ;;  %v3215_v31 = vld [vmem:[%s5044_s1 + $0xc0] sm:$0xff] (!%p287_p2)  ;;  %s4235_s26 = smov (!%p287_p2), 48   ;;  %s5053_s27 = smov (!%p287_p2), 8  }
   0xc   : > { %3914 = vmatpush3.bf16.msra.mxu0 (!%p287_p2), %v3913_v7  ;;  %v3216_v32 = vld [vmem:[%s5044_s1 + $0xc8] sm:$0xff] (!%p287_p2)  ;;  %v3925_v33 = vpack.c.bf16 (!%p287_p2), %v343_v29, %v342_v28  ;;  %v344_v34 = vld [vmem:[%s5044_s1 + $0x60] sm:$0xff] (!%p287_p2)  ;;  %v3217_v37 = vld [vmem:[%s5044_s1 + $0xd0] sm:$0xff] (!%p287_p2)  ;;  %s5055_s28 = smov (!%p287_p2), 16   ;;  %s5054_s29 = smov (!%p287_p2), 24  }
   0xd   : > { %3915 = vmatprep.subr.bf16.mxu0 %v4222_v3  ;;  %v345_v35 = vld [vmem:[%s5044_s1 + $0x68] sm:$0xff]  ;;  %v3946_v36 = vpack.c.bf16 %v3216_v32, %v3215_v31  ;;  %s322_s21 = scalar_select %p321_p3, %s4295_s10, 1  ;;  %v3218_v38 = vld [vmem:[%s5044_s1 + $0xd8] sm:$0xff]  ;;  %v346_v40 = vld [vmem:[%s5044_s1 + $0x70] sm:$0xff] }
   0xe   : > { %3938 = vmatpush3.bf16.msra.mxu1 %v3937_v18  ;;  %v3928_v39 = vpack.c.bf16 %v345_v35, %v344_v34  ;;  %v347_v41 = vld [vmem:[%s5044_s1 + $0x78] sm:$0xff]  ;;  %v3949_v42 = vpack.c.bf16 %v3218_v38, %v3217_v37  ;;  %v3219_v43 = vld [vmem:[%s5044_s1 + $0xe0] sm:$0xff]  ;;  %v3220_v44 = vld [vmem:[%s5044_s1 + $0xe8] sm:$0xff]  ;;  %s5057_s12 = smov 16   ;;  %s5058_s13 = smov 24  }
   0xf   : > { %3939 = vmatprep.subr.bf16.mxu1 %v4222_v3  ;;  %s3204_s11 = sshll.u32 %s322_s21, 3  ;;  %v3931_v45 = vpack.c.bf16 %v347_v41, %v346_v40  ;;  %v3952_v46 = vpack.c.bf16 %v3220_v44, %v3219_v43  ;;  %v3221_v48 = vld [vmem:[%s5044_s1 + $0xf0] sm:$0xff]  ;;  %v3222_v49 = vld [vmem:[%s5044_s1 + $0xf8] sm:$0xff]  ;;  %v3225_v51 = vld [vmem:[%s5044_s1 + $0x100] sm:$0xff]  ;;  %s4230_s21 = smov 80  }
  0x10   : > { %3917 = vmatpush3.bf16.msra.mxu0 %v3916_v15  ;;  %s324_s18 = scalar_lea.vmem %s5043_s0, %s3204_s11  ;;  %v3955_v50 = vpack.c.bf16 %v3222_v49, %v3221_v48  ;;  %v3226_v52 = vld [vmem:[%s5044_s1 + $0x108] sm:$0xff]  ;;  %v3227_v53 = vld [vmem:[%s5044_s1 + $0x110] sm:$0xff]  ;;  %v3228_v55 = vld [vmem:[%s5044_s1 + $0x118] sm:$0xff]  ;;  %s325_s11 = smul.u32 3, %s4295_s10 }
  0x11   : > { %3918 = vmatprep.subr.bf16.mxu0 %v4222_v3  ;;  %v331_v47 = vld [vmem:[%s324_s18] sm:$0xff]  ;;  %v3958_v54 = vpack.c.bf16 %v3226_v52, %v3225_v51  ;;  %v3961_v56 = vpack.c.bf16 %v3228_v55, %v3227_v53  ;;  %v3230_v58 = vld [vmem:[%s5044_s1 + $0x128] sm:$0xff]  ;;  %v3231_v60 = vld [vmem:[%s5044_s1 + $0x130] sm:$0xff]  ;;  %s4227_s18 = smov 88  }
  0x12   : > { %3941 = vmatpush3.bf16.msra.mxu1 %v3940_v24  ;;  %v3229_v57 = vld [vmem:[%s5044_s1 + $0x120] sm:$0xff]  ;;  %v3232_v61 = vld [vmem:[%s5044_s1 + $0x138] sm:$0xff]  ;;  %v3234_v0 = vld [vmem:[%s5044_s1 + $0x148] sm:$0xff]  ;;  %p326_p4 = scmp.lt.s32.totalorder %s325_s11, 5 }
  0x13   : > { %3942 = vmatprep.subr.bf16.mxu1 %v4222_v3  ;;  %v3964_v59 = vpack.c.bf16 %v3230_v58, %v3229_v57  ;;  %v3967_v62 = vpack.c.bf16 %v3232_v61, %v3231_v60  ;;  %v3233_v63 = vld [vmem:[%s5044_s1 + $0x140] sm:$0xff]  ;;  %v3235_v2 = vld [vmem:[%s5044_s1 + $0x150] sm:$0xff]  ;;  %v3236_v4 = vld [vmem:[%s5044_s1 + $0x158] sm:$0xff] }
  0x14   : > { %3920 = vmatpush3.bf16.msra.mxu0 %v3919_v21  ;;  %v3970_v1 = vpack.c.bf16 %v3234_v0, %v3233_v63  ;;  %v3973_v5 = vpack.c.bf16 %v3236_v4, %v3235_v2  ;;  %v3237_v7 = vld [vmem:[%s5044_s1 + $0x160] sm:$0xff]  ;;  %v3238_v8 = vld [vmem:[%s5044_s1 + $0x168] sm:$0xff]  ;;  %v3239_v14 = vld [vmem:[%s5044_s1 + $0x170] sm:$0xff]  ;;  %s5060_s11 = smov (!%p326_p4, %s325_s11), 5 }
  0x15   : > { %3921 = vmatprep.subr.bf16.mxu0 %v4222_v3  ;;  %v3976_v9 = vpack.c.bf16 %v3238_v8, %v3237_v7  ;;  %v3206_v10 = vld [vmem:[%s5045_s2] ss:$0 sm:$0xff]  ;;  %v3240_v15 = vld [vmem:[%s5044_s1 + $0x178] sm:$0xff]  ;;  %v3224_v17 = vld [vmem:[%s5045_s2 + $0x1] ss:$0 sm:$0xff] }
  0x16   : > { %3944 = vmatpush3.bf16.msra.mxu1 %v3943_v30  ;;  %v3979_v16 = vpack.c.bf16 %v3240_v15, %v3239_v14  ;;  %v3242_v21 = vld [vmem:[%s5045_s2 + $0x2] ss:$0 sm:$0xff]  ;;  %v646_v32 = vld [vmem:[%s5048_s5 + $0x8] sm:$0xff]  ;;  %v647_v34 = vld [vmem:[%s5048_s5 + $0x10] sm:$0xff] }
  0x17   : > { %3945 = vmatprep.subr.bf16.mxu1 %v4222_v3  ;;  %v645_v31 = vld [vmem:[%s5048_s5] sm:$0xff]  ;;  %v648_v35 = vld [vmem:[%s5048_s5 + $0x18] sm:$0xff] }
  0x18   : > { %3923 = vmatpush3.bf16.msra.mxu0 %v3922_v27  ;;  %v4519_v43 = vld [vmem:[%s5051_s8] sm:$0xff] }
  0x19   : > { %3924 = vmatprep.subr.bf16.mxu0 %v4222_v3  ;;  %v3243_v51 = vld [vmem:[%s5049_s6] ss:$0 sm:$0xff] }
  0x1a   : > { %3947 = vmatpush3.bf16.msra.mxu1 %v3946_v36  ;;  %v3985_v36 = vpack.c.bf16 %v648_v35, %v647_v34 }
  0x1b   : > { %3948 = vmatprep.subr.bf16.mxu1 %v4222_v3 }
  0x1c   : > { %3926 = vmatpush3.bf16.msra.mxu0 %v3925_v33  ;;  %v3982_v33 = vpack.c.bf16 %v646_v32, %v645_v31 }
  0x1d   : > { %3927 = vmatprep.subr.bf16.mxu0 %v4222_v3 }
  0x1e   : > { %3950 = vmatpush3.bf16.msra.mxu1 %v3949_v42 }
  0x1f   : > { %3951 = vmatprep.subr.bf16.mxu1 %v4222_v3 }
  0x20   : > { %3929 = vmatpush3.bf16.msra.mxu0 %v3928_v39  ;;  %v635_v39 = vlaneseq }
  0x21   : > { %3930 = vmatprep.subr.bf16.mxu0 %v4222_v3 }
  0x22   : > { %3953 = vmatpush3.bf16.msra.mxu1 %v3952_v46  ;;  %v4513_v41 = vshrl.u32 %v635_v39, 7 }
  0x23   : > { %3954 = vmatprep.subr.bf16.mxu1 %v4222_v3 }
  0x24   : > { %3932 = vmatpush3.bf16.msra.mxu0 %v3931_v45  ;;  %v637_v42 = vsub.s32 0, %v4513_v41  ;;  %v642_v44 = vsub.s32 1, %v4513_v41 }
  0x25   : > { %3957 = vmatprep.subr.bf16.mxu0 %v4222_v3 }
  0x26   : > { %3956 = vmatpush3.bf16.msra.mxu1 %v3955_v50  ;;  %v638_v45 = vrot.slane %v4519_v43, %v637_v42  ;;  %v643_v48 = vrot.slane %v4519_v43, %v642_v44 }
  0x27   : > { %3546 = vmatmul.mubr.f32.vlgmr.msra.gmra.mrb[0].mxu0 %v331_v47  ;;  %3634 = vmatprep.subr.mxu1 %v4224_v6 }
  0x28   : > { %3615 = vmatprep.mubr.msk.f32.mxu0 %vm4223_vm0, %v4224_v6  ;;  %3959 = vmatpush3.bf16.msra.mxu0 %v3958_v54 }
  0x29   : > { %3960 = vmatprep.subr.bf16.mxu0 %v4222_v3 }
  0x2c   : > { %3962 = vmatpush3.bf16.msra.mxu0 %v3961_v56 }
  0x2d   : > { %3963 = vmatprep.subr.bf16.mxu0 %v4222_v3 }
  0x30   : > { %3965 = vmatpush3.bf16.msra.mxu0 %v3964_v59 }
  0x31   : > { %3966 = vmatprep.subr.bf16.mxu0 %v4222_v3 }
  0x34   : > { %3968 = vmatpush3.bf16.msra.mxu0 %v3967_v62 }
  0x35   : > { %3969 = vmatprep.subr.bf16.mxu0 %v4222_v3 }
  0x38   : > { %3971 = vmatpush3.bf16.msra.mxu0 %v3970_v1 }
  0x39   : > { %3972 = vmatprep.subr.bf16.mxu0 %v4222_v3 }
  0x3c   : > { %3974 = vmatpush3.bf16.msra.mxu0 %v3973_v5 }
  0x3d   : > { %3975 = vmatprep.subr.bf16.mxu0 %v4222_v3 }
  0x40   : > { %3977 = vmatpush3.bf16.msra.mxu0 %v3976_v9 }
  0x41   : > { %3978 = vmatprep.subr.bf16.mxu0 %v4222_v3 }
  0x44   : > { %3980 = vmatpush3.bf16.msra.mxu0 %v3979_v16 }
  0x45   : > { %3981 = vmatprep.subr.bf16.mxu0 %v4222_v3 }
  0xfa   : > { %v421_v11 = vpop.f32.mrb[0].mxu0 }
  0xfb   : > { %v422_v12 = vadd.f32 %v3206_v10, %v421_v11  ;;  %v3547_v13 = vpop.f32.mrb[1].mxu0 }
  0xfd   : > { %3581 = vmatmul.mubr.f32.vlgmr.msra.gmra.mrb[0].mxu1 %v422_v12 }
  0xfe   : > { %3636 = vmatprep.mubr.msk.f32.mxu1 %vm4223_vm0, %v4224_v6 }
 0x1d0   : > { %v516_v18 = vpop.f32.mrb[0].mxu1 }
 0x1d1   : > { %v517_v19 = vadd.f32 %v3224_v17, %v516_v18  ;;  %v3582_v20 = vpop.f32.mrb[1].mxu1 }
 0x1d3   : > { %3616 = vmatmul.mubr.f32.vlgmr.msra.gmra.mrb[2].mxu0 %v517_v19 }
 0x1d4   : > { %3626 = vmatprep.mubr.msk.f32.mxu0 %vm4223_vm0, %v4224_v6  ;;  %3983 = vmatpush3.bf16.msra.mxu0 %v3982_v33 }
 0x1d5   : > { %3984 = vmatprep.subr.bf16.mxu0 %v4222_v3 }
 0x1d8   : > { %3986 = vmatpush3.bf16.msra.mxu0 %v3985_v36 }
 0x1d9   : > { %3629 = vmatprep.subr.mxu0 %v4224_v6 }
 0x2a6   : > { %v611_v22 = vpop.f32.mrb[2].mxu0 }
 0x2a7   : > { %v4493_v23 = vadd.f32 %v3242_v21, %v611_v22  ;;  %v3617_v24 = vpop.f32.mrb[3].mxu0 }
 0x2a9   : > { %v621_v25 = vsel %vm620_vm1, %v4493_v23, 0.0 }
 0x2aa   : > { %622 = vadd.xlane.f32.xlu0 %v621_v25 }
 0x337   : > { %v623_v26 = vpop.xlane.xlu0 %622 }
 0x338   : > { %v625_v27 = vmul.f32 0.03125, %v623_v26 }
 0x33a   : > { %v626_v28 = vsub.f32 %v4493_v23, %v625_v27 }
 0x33c   : > { %v627_v29 = vmul.f32 %v626_v28, %v626_v28 }
 0x33e   : > { %v628_v30 = vsel %vm620_vm1, %v627_v29, 0.0 }
 0x33f   : > { %629 = vadd.xlane.f32.xlu0 %v628_v30 }
 0x3cc   : > { %v630_v37 = vpop.xlane.xlu0 %629 }
 0x3cd   : > { %v631_v38 = vmul.f32 0.03125, %v630_v37 }
 0x3cf   : > { %v632_v40 = vadd.f32 1e-05, %v631_v38 }
 0x3d1   : > { %4166 = vrsqrt.f32 %v632_v40 }
 0x3db   : > { %v4167_v46 = vpop.eup %4166 }
 0x3dc   : > { %v634_v47 = vmul.f32 %v4167_v46, %v626_v28 }
 0x3de   : > { %v639_v49 = vmul.f32 %v638_v45, %v634_v47 }
 0x3e0   : > { %v644_v50 = vadd.f32 %v643_v48, %v639_v49 }
 0x3e2   : > { %3627 = vmatmul.mubr.msk.f32.vlgmr.msra.gmra.mrb[4].mxu0 %vm620_vm1, %v644_v50 }
 0x3e3   : > { %3631 = vmatprep.mubr.msk.f32.mxu0 %vm4223_vm0, %v4224_v6 }
 0x4b5   : > { %v725_v52 = vpop.f32.mrb[4].mxu0 }
 0x4b6   : > { %v4534_v53 = vadd.f32 %v3243_v51, %v725_v52  ;;  %v3628_v54 = vpop.f32.mrb[5].mxu0 }
 0x4b8   : > { %819 = vrot.lane.b32.xlu0 %v4534_v53, %s4225_s16  ;;  %730 = vrot.lane.b32.xlu1 %v4534_v53, %s4226_s17 }
 0x4bc   : > { %897 = vrot.lane.b32.xlu0 %v4534_v53, %s4227_s18 }
 0x52a   : > { %v820_v55 = vpop.permute.xlu0 %819  ;;  %v731_v56 = vpop.permute.xlu1 %730 }
 0x52b   : > { %3630 = vmatpush3.xpose.msk.msra.mxu0 %vm732_vm2, %v731_v56  ;;  %3635 = vmatpush3.msra.mxu1 %v820_v55 }
 0x52c   : > { %3639 = vmatprep.subr.mxu1 %v4224_v6  ;;  %3659 = vmatprep.subr.mxu0 %v4224_v6 }
 0x52e   : > { %3632 = vmatmul.mubr.msk.f32.vlgmr.msra.gmra.mrb[6].mxu0 %vm732_vm2, %v4534_v53  ;;  %v898_v2 = vpop.permute.xlu0 %897 }
 0x52f   : > { %3661 = vmatprep.mubr.msk.f32.mxu0 %vm4223_vm0, %v4224_v6 }
 0x601   : > { %v803_v57 = vpop.f32.mrb[6].mxu0 }
 0x602   : > { %v807_v58 = vmul.f32 0.6, %v803_v57  ;;  %v3633_v59 = vpop.f32.mrb[7].mxu0 }
 0x604   : > { %v808_v60 = vsel %vm732_vm2, %v807_v58, -inf }
 0x605   : > { %809 = vmax.xlane.f32.xlu1 %v808_v60 }
 0x692   : > { %v810_v61 = vpop.xlane.xlu1 %809 }
 0x693   : > { %v811_v62 = vsub.f32 %v807_v58, %v810_v61  ;;  %v615_v61 = vld [vmem:[%s5050_s7] sm:$0xff] }
 0x695   : > { %v812_v63 = vmul.f32 1.442695, %v811_v62  ;;  %v616_v62 = vld [vmem:[%s5050_s7 + $0x8] sm:$0xff] }
 0x697   : > { %4168 = vpow2.f32 %v812_v63  ;;  %v3988_v63 = vpack.c.bf16 %v616_v62, %v615_v61 }
 0x6a1   : > { %v4169_v0 = vpop.eup %4168 }
 0x6a2   : > { %v814_v1 = vsel %vm732_vm2, %v4169_v0, 0.0 }
 0x6a3   : > { %815 = vadd.xlane.f32.xlu0 %v814_v1  ;;  %v618_v1 = vld [vmem:[%s5050_s7 + $0x18] sm:$0xff] }
 0x6b9   : > { %895 = vrot.lane.b32.xlu0 %v4534_v53, %s4228_s19 }
 0x730   : > { %v816_v4 = vpop.xlane.xlu0 %815 }
 0x731   : > { %4170 = vrcp.f32 %v816_v4 }
 0x734   : > { %v896_v8 = vpop.permute.xlu0 %895 }
 0x73b   : > { %v4171_v5 = vpop.eup %4170 }
 0x73c   : > { %v818_v7 = vmul.f32 %v4171_v5, %v4169_v0  ;;  %v617_v0 = vld [vmem:[%s5050_s7 + $0x10] sm:$0xff] }
 0x73e   : > { %3637 = vmatmul.mubr.msk.f32.vlgmr.msra.gmra.mrb[2].mxu1 %vm732_vm2, %v818_v7 }
 0x73f   : > { %3640 = vmatpush3.xpose.msk.msra.mxu1 %vm732_vm2, %v898_v2  ;;  %3641 = vmatprep.mubr.msk.f32.mxu1 %vm4223_vm0, %v4224_v6  ;;  %v3991_v2 = vpack.c.bf16 %v618_v1, %v617_v0 }
 0x740   : > { %3644 = vmatprep.subr.mxu1 %v4224_v6 }
 0x742   : > { %3642 = vmatmul.mubr.msk.f32.vlgmr.msra.gmra.mrb[4].mxu1 %vm732_vm2, %v896_v8 }
 0x743   : > { %3646 = vmatprep.mubr.msk.f32.mxu1 %vm4223_vm0, %v4224_v6 }
 0x811   : > { %v4561_v9 = vpop.f32.mrb[2].mxu1 }
 0x812   : > { %v3638_v10 = vpop.f32.mrb[3].mxu1 }
 0x815   : > { %v969_v11 = vpop.f32.mrb[4].mxu1 }
 0x816   : > { %v973_v12 = vmul.f32 0.6, %v969_v11  ;;  %v3643_v13 = vpop.f32.mrb[5].mxu1 }
 0x818   : > { %v974_v14 = vsel %vm732_vm2, %v973_v12, -inf }
 0x819   : > { %975 = vmax.xlane.f32.xlu1 %v974_v14 }
 0x82a   : > { %985 = vrot.lane.b32.xlu1 %v4534_v53, %s4229_s20 }
 0x82e   : > { %1063 = vrot.lane.b32.xlu1 %v4534_v53, %s4230_s21 }
 0x832   : > { %1061 = vrot.lane.b32.xlu1 %v4534_v53, %s4231_s22 }
 0x836   : > { %1229 = vrot.lane.b32.xlu1 %v4534_v53, %s4232_s23 }
 0x8a6   : > { %v976_v15 = vpop.xlane.xlu1 %975 }
 0x8a7   : > { %v977_v16 = vsub.f32 %v973_v12, %v976_v15 }
 0x8a9   : > { %v978_v17 = vmul.f32 1.442695, %v977_v16  ;;  %v1412_v16 = vsub.s32 4, %v4513_v41 }
 0x8aa   : > { %v986_v18 = vpop.permute.xlu1 %985 }
 0x8ab   : > { %4172 = vpow2.f32 %v978_v17  ;;  %3645 = vmatpush3.msra.mxu1 %v986_v18  ;;  %v1413_v17 = vrot.slane %v4519_v43, %v1412_v16 }
 0x8ac   : > { %3649 = vmatprep.subr.mxu1 %v4224_v6 }
 0x8ae   : > { %v1064_v19 = vpop.permute.xlu1 %1063 }
 0x8b2   : > { %v1062_v20 = vpop.permute.xlu1 %1061 }
 0x8b5   : > { %v4173_v21 = vpop.eup %4172 }
 0x8b6   : > { %v1230_v22 = vpop.permute.xlu1 %1229  ;;  %v980_v24 = vsel %vm732_vm2, %v4173_v21, 0.0 }
 0x8b7   : > { %981 = vadd.xlane.f32.xlu0 %v980_v24  ;;  %3660 = vmatpush3.xpose.msk.msra.mxu0 %vm732_vm2, %v1230_v22  ;;  %v4131_v22 = vpack.i.bf16 %v618_v1, %v617_v0 }
 0x8b8   : > { %3987 = vmatprep.subr.bf16.mxu0 %v4222_v3 }
 0x8cd   : > { %1227 = vrot.lane.b32.xlu0 %v4534_v53, %s4233_s24 }
 0x944   : > { %v982_v25 = vpop.xlane.xlu0 %981 }
 0x945   : > { %4174 = vrcp.f32 %v982_v25 }
 0x948   : > { %v1228_v26 = vpop.permute.xlu0 %1227 }
 0x949   : > { %3662 = vmatmul.mubr.msk.f32.vlgmr.msra.gmra.mrb[8].mxu0 %vm732_vm2, %v1228_v26 }
 0x94a   : > { %3677 = vmatprep.mubr.msk.f32.mxu0 %vm4223_vm0, %v4224_v6  ;;  %3989 = vmatpush3.bf16.msra.mxu0 %v3988_v63 }
 0x94b   : > { %3990 = vmatprep.subr.bf16.mxu0 %v4222_v3 }
 0x94e   : > { %3992 = vmatpush3.bf16.msra.mxu0 %v3991_v2 }
 0x94f   : > { %v4175_v27 = vpop.eup %4174  ;;  %3999 = vmatprep.subr.bf16.mxu0 %v4222_v3 }
 0x950   : > { %v984_v28 = vmul.f32 %v4175_v27, %v4173_v21 }
 0x952   : > { %3647 = vmatmul.mubr.msk.f32.vlgmr.msra.gmra.mrb[6].mxu1 %vm732_vm2, %v984_v28 }
 0x953   : > { %3650 = vmatpush3.xpose.msk.msra.mxu1 %vm732_vm2, %v1064_v19  ;;  %3651 = vmatprep.mubr.msk.f32.mxu1 %vm4223_vm0, %v4224_v6 }
 0x954   : > { %3654 = vmatprep.subr.mxu1 %v4224_v6 }
 0x956   : > { %3652 = vmatmul.mubr.msk.f32.vlgmr.msra.gmra.mrb[8].mxu1 %vm732_vm2, %v1062_v20 }
 0x957   : > { %3656 = vmatprep.mubr.msk.f32.mxu1 %vm4223_vm0, %v4224_v6 }
 0xa1c   : > { %v1301_v29 = vpop.f32.mrb[8].mxu0 }
 0xa1d   : > { %v1305_v30 = vmul.f32 0.6, %v1301_v29  ;;  %v3663_v31 = vpop.f32.mrb[9].mxu0  ;;  %v4126_v29 = vpack.i.bf16 %v616_v62, %v615_v61  ;;  %v1513_v61 = vsub.s32 5, %v4513_v41 }
 0xa1f   : > { %v1306_v32 = vsel %vm732_vm2, %v1305_v30, -inf  ;;  %v1514_v62 = vrot.slane %v4519_v43, %v1513_v61 }
 0xa20   : > { %1307 = vmax.xlane.f32.xlu0 %v1306_v32 }
 0xa25   : > { %v1057_v33 = vpop.f32.mrb[6].mxu1 }
 0xa26   : > { %v3648_v34 = vpop.f32.mrb[7].mxu1 }
 0xa29   : > { %v1135_v35 = vpop.f32.mrb[8].mxu1 }
 0xa2a   : > { %v1139_v36 = vmul.f32 0.6, %v1135_v35  ;;  %v3653_v37 = vpop.f32.mrb[9].mxu1 }
 0xa2c   : > { %v1140_v38 = vsel %vm732_vm2, %v1139_v36, -inf }
 0xa2d   : > { %1141 = vmax.xlane.f32.xlu1 %v1140_v38 }
 0xa36   : > { %1317 = vrot.lane.b32.xlu0 %v4534_v53, %s4234_s25 }
 0xaad   : > { %v1308_v39 = vpop.xlane.xlu0 %1307 }
 0xaae   : > { %v1309_v40 = vsub.f32 %v1305_v30, %v1308_v39 }
 0xab0   : > { %v1310_v45 = vmul.f32 1.442695, %v1309_v40 }
 0xab1   : > { %v1318_v60 = vpop.permute.xlu0 %1317 }
 0xab2   : > { %4176 = vpow2.f32 %v1310_v45  ;;  %v1503_v45 = vsub.s32 2, %v4513_v41 }
 0xaba   : > { %v1142_v46 = vpop.xlane.xlu1 %1141 }
 0xabb   : > { %v1143_v47 = vsub.f32 %v1139_v36, %v1142_v46  ;;  %v1508_v46 = vsub.s32 3, %v4513_v41 }
 0xabc   : > { %v4177_v48 = vpop.eup %4176 }
 0xabd   : > { %v1144_v49 = vmul.f32 1.442695, %v1143_v47  ;;  %v1312_v50 = vsel %vm732_vm2, %v4177_v48, 0.0  ;;  %v1504_v47 = vrot.slane %v4519_v43, %v1503_v45 }
 0xabe   : > { %1313 = vadd.xlane.f32.xlu1 %v1312_v50  ;;  %v1509_v50 = vrot.slane %v4519_v43, %v1508_v46 }
 0xabf   : > { %4178 = vpow2.f32 %v1144_v49 }
 0xac9   : > { %v4179_v51 = vpop.eup %4178 }
 0xaca   : > { %v1146_v52 = vsel %vm732_vm2, %v4179_v51, 0.0 }
 0xacb   : > { %1147 = vadd.xlane.f32.xlu1 %v1146_v52 }
 0xadc   : > { %1151 = vrot.lane.b32.xlu1 %v4534_v53, %s4235_s26 }
 0xae0   : > { %1394 = vrot.lane.b32.xlu1 %v1057_v33, %s5053_s27 }
 0xb4b   : > { %v1314_v54 = vpop.xlane.xlu1 %1313 }
 0xb58   : > { %v1148_v55 = vpop.xlane.xlu1 %1147 }
 0xb59   : > { %4180 = vrcp.f32 %v1148_v55 }
 0xb5a   : > { %4182 = vrcp.f32 %v1314_v54 }
 0xb5c   : > { %v1152_v56 = vpop.permute.xlu1 %1151 }
 0xb5d   : > { %3655 = vmatpush3.msra.mxu1 %v1152_v56 }
 0xb5e   : > { %3664 = vmatprep.subr.mxu1 %v4224_v6 }
 0xb60   : > { %v1395_v10 = vpop.permute.xlu1 %1394 }
 0xb61   : > { %v1405_v12 = vsel %vm732_vm2, %v4561_v9, %v1395_v10 }
 0xb63   : > { %v4181_v57 = vpop.eup %4180 }
 0xb64   : > { %v1150_v58 = vmul.f32 %v4181_v57, %v4179_v51  ;;  %v4183_v59 = vpop.eup %4182 }
 0xb65   : > { %v1316_v53 = vmul.f32 %v4183_v59, %v4177_v48 }
 0xb66   : > { %3657 = vmatmul.mubr.msk.f32.vlgmr.msra.gmra.mrb[10].mxu1 %vm732_vm2, %v1150_v58 }
 0xb67   : > { %3665 = vmatpush3.msra.mxu1 %v1318_v60  ;;  %3666 = vmatprep.mubr.msk.f32.mxu1 %vm4223_vm0, %v4224_v6 }
 0xb68   : > { %3993 = vmatprep.subr.bf16.mxu1 %v4222_v3 }
 0xb6a   : > { %3667 = vmatmul.mubr.msk.f32.vlgmr.msra.gmra.mrb[12].mxu1 %vm732_vm2, %v1316_v53 }
 0xb6b   : > { %3688 = vmatprep.mubr.msk.f32.mxu1 %vm4223_vm0, %v4224_v6 }
 0xc39   : > { %v1223_v4 = vpop.f32.mrb[10].mxu1 }
 0xc3a   : > { %1398 = vrot.lane.b32.xlu1 %v1223_v4, %s5055_s28  ;;  %v3658_v5 = vpop.f32.mrb[11].mxu1  ;;  %s3205_s28 = sshll.u32 %s5060_s11, 3 }
 0xc3d   : > { %v1389_v7 = vpop.f32.mrb[12].mxu1 }
 0xc3e   : > { %1402 = vrot.lane.b32.xlu1 %v1389_v7, %s5054_s29  ;;  %v3668_v8 = vpop.f32.mrb[13].mxu1 }
 0xcac   : > { %v1399_v11 = vpop.permute.xlu1 %1398 }
 0xcad   : > { %v1407_v13 = vsel %vm1406_vm3, %v1405_v12, %v1399_v11 }
 0xcb0   : > { %v1403_v14 = vpop.permute.xlu1 %1402 }
 0xcb1   : > { %v1409_v15 = vsel %vm1408_vm4, %v1407_v13, %v1403_v14 }
 0xcb2   : > { %3678 = vmatmul.mubr.msk.f32.vlgmr.msra.gmra.mrb[10].mxu0 %vm620_vm1, %v1409_v15 }
 0xcb3   : > { %3699 = vmatprep.mubr.msk.f32.mxu0 %vm4223_vm0, %v4224_v6 }
 0xd85   : > { %v1483_v18 = vpop.f32.mrb[10].mxu0 }
 0xd86   : > { %v1484_v19 = vadd.f32 %v1483_v18, %v1413_v17  ;;  %v3679_v20 = vpop.f32.mrb[11].mxu0 }
 0xd88   : > { %v4634_v9 = vadd.f32 %v1484_v19, %v4493_v23 }
 0xd8a   : > { %v1488_v21 = vsel %vm620_vm1, %v4634_v9, 0.0 }
 0xd8b   : > { %1489 = vadd.xlane.f32.xlu1 %v1488_v21 }
 0xd9c   : > { %4132 = vrot.lane.b32.xlu1 %v4131_v22, %s4226_s17 }
 0xda0   : > { %4137 = vrot.lane.b32.xlu1 %v4126_v29, %s4225_s16 }
 0xe18   : > { %v1490_v24 = vpop.xlane.xlu1 %1489 }
 0xe19   : > { %v1491_v25 = vmul.f32 0.03125, %v1490_v24 }
 0xe1b   : > { %v1492_v26 = vsub.f32 %v4634_v9, %v1491_v25 }
 0xe1c   : > { %v4133_v32 = vpop.permute.xlu1 %4132 }
 0xe1d   : > { %v1493_v27 = vmul.f32 %v1492_v26, %v1492_v26  ;;  %v4135_v35 = vunpack.i.h.bf16 %v4133_v32  ;;  %v4134_v38 = vunpack.i.l.bf16 %v4133_v32  ;;  %v1633_v32 = vsub.s32 6, %v4513_v41 }
 0xe1f   : > { %v1494_v28 = vsel %vm620_vm1, %v1493_v27, 0.0  ;;  %v3997_v40 = vpack.c.bf16 %v4135_v35, %v4134_v38 }
 0xe20   : > { %1495 = vadd.xlane.f32.xlu0 %v1494_v28  ;;  %v4138_v54 = vpop.permute.xlu1 %4137 }
 0xe21   : > { %v4140_v55 = vunpack.i.h.bf16 %v4138_v54  ;;  %v4139_v56 = vunpack.i.l.bf16 %v4138_v54 }
 0xe23   : > { %v4000_v57 = vpack.c.bf16 %v4140_v55, %v4139_v56 }
 0xe25   : > { %4001 = vmatpush3.bf16.msra.mxu0 %v4000_v57 }
 0xe26   : > { %4002 = vmatprep.subr.bf16.mxu0 %v4222_v3 }
 0xe36   : > { %4127 = vrot.lane.b32.xlu0 %v4126_v29, %s4226_s17 }
 0xe3a   : > { %4142 = vrot.lane.b32.xlu0 %v4131_v22, %s4225_s16 }
 0xead   : > { %v1496_v30 = vpop.xlane.xlu0 %1495 }
 0xeae   : > { %v1497_v31 = vmul.f32 0.03125, %v1496_v30 }
 0xeb0   : > { %v1498_v33 = vadd.f32 1e-05, %v1497_v31 }
 0xeb1   : > { %v4128_v34 = vpop.permute.xlu0 %4127 }
 0xeb2   : > { %4184 = vrsqrt.f32 %v1498_v33  ;;  %v4130_v36 = vunpack.i.h.bf16 %v4128_v34  ;;  %v4129_v37 = vunpack.i.l.bf16 %v4128_v34  ;;  %v1634_v33 = vrot.slane %v4519_v43, %v1633_v32  ;;  %v3267_v43 = vld [vmem:[%s5048_s5 + $0x20] sm:$0xff] }
 0xeb4   : > { %v3994_v39 = vpack.c.bf16 %v4130_v36, %v4129_v37 }
 0xeb5   : > { %v4143_v58 = vpop.permute.xlu0 %4142 }
 0xeb6   : > { %3995 = vmatpush3.bf16.msra.mxu1 %v3994_v39  ;;  %v4145_v59 = vunpack.i.h.bf16 %v4143_v58  ;;  %v4144_v60 = vunpack.i.l.bf16 %v4143_v58  ;;  %v4694_v58 = vld [vmem:[%s5051_s8 + $0x8] sm:$0xff] }
 0xeb7   : > { %3996 = vmatprep.subr.bf16.mxu1 %v4222_v3 }
 0xeb8   : > { %v4003_v53 = vpack.c.bf16 %v4145_v59, %v4144_v60  ;;  %v1744_v59 = vrot.slane %v4694_v58, %v637_v42 }
 0xeba   : > { %3998 = vmatpush3.bf16.msra.mxu1 %v3997_v40  ;;  %4004 = vmatpush3.bf16.msra.mxu0 %v4003_v53 }
 0xebb   : > { %4005 = vmatprep.subr.bf16.mxu1 %v4222_v3  ;;  %3713 = vmatprep.subr.mxu0 %v4224_v6 }
 0xebc   : > { %v4185_v48 = vpop.eup %4184 }
 0xebd   : > { %v1500_v49 = vmul.f32 %v4185_v48, %v1492_v26 }
 0xebf   : > { %v1505_v51 = vmul.f32 %v1504_v47, %v1500_v49 }
 0xec1   : > { %v1510_v52 = vadd.f32 %v1509_v50, %v1505_v51  ;;  %v3269_v51 = vld [vmem:[%s5048_s5 + $0x30] sm:$0xff] }
 0xec3   : > { %3689 = vmatmul.mubr.msk.f32.vlgmr.msra.gmra.mrb[14].mxu1 %vm620_vm1, %v1510_v52  ;;  %v3270_v52 = vld [vmem:[%s5048_s5 + $0x38] sm:$0xff] }
 0xec4   : > { %3710 = vmatprep.mubr.msk.f32.mxu1 %vm4223_vm0, %v4224_v6  ;;  %v4009_v54 = vpack.c.bf16 %v3270_v52, %v3269_v51 }
 0xf96   : > { %v1600_v63 = vpop.f32.mrb[14].mxu1 }
 0xf97   : > { %v1601_v0 = vadd.f32 %v1600_v63, %v1514_v62  ;;  %v3690_v1 = vpop.f32.mrb[15].mxu1  ;;  %v1749_v62 = vrot.slane %v4694_v58, %v642_v44 }
 0xf98   : > { %v3272_v1 = vld [vmem:[%s5049_s6 + $0x1] ss:$0 sm:$0xff] }
 0xf99   : > { %v1605_v2 = vmul.f32 0.70710677, %v1601_v0  ;;  %v1604_v29 = vmul.f32 0.5, %v1601_v0 }
 0xf9b   : > { %v1606_v4 = vand.u32 2147483647, %v1605_v2  ;;  %vm1626_vm5 = vcmp.lt.f32.partialorder %v1605_v2, 0.0 }
 0xf9d   : > { %v1607_v5 = vmul.f32 0.3275911, %v1606_v4  ;;  %v1620_v8 = vsub.f32 0.0, %v1606_v4 }
 0xf9f   : > { %v1608_v7 = vadd.f32 1.0, %v1607_v5  ;;  %v1621_v11 = vmul.f32 %v1620_v8, %v1606_v4 }
 0xfa1   : > { %4186 = vrcp.f32 %v1608_v7  ;;  %v1622_v14 = vmul.f32 1.442695, %v1621_v11 }
 0xfa3   : > { %4188 = vpow2.f32 %v1622_v14 }
 0xfab   : > { %v4187_v10 = vpop.eup %4186 }
 0xfac   : > { %v1611_v12 = vmul.f32 1.0614054, %v4187_v10 }
 0xfad   : > { %v4189_v24 = vpop.eup %4188 }
 0xfae   : > { %v3259_v13 = vadd.f32 -1.4531521, %v1611_v12 }
 0xfb0   : > { %v1613_v15 = vmul.f32 %v4187_v10, %v3259_v13 }
 0xfb2   : > { %v1614_v17 = vadd.f32 1.4214138, %v1613_v15 }
 0xfb4   : > { %v1615_v18 = vmul.f32 %v4187_v10, %v1614_v17 }
 0xfb6   : > { %v3260_v19 = vadd.f32 -0.28449672, %v1615_v18 }
 0xfb8   : > { %v1617_v20 = vmul.f32 %v4187_v10, %v3260_v19 }
 0xfba   : > { %v1618_v21 = vadd.f32 0.2548296, %v1617_v20 }
 0xfbc   : > { %v1619_v22 = vmul.f32 %v4187_v10, %v1618_v21 }
 0xfbe   : > { %v1624_v25 = vmul.f32 %v4189_v24, %v1619_v22 }
 0xfc0   : > { %v1625_v26 = vsub.f32 1.0, %v1624_v25 }
 0xfc2   : > { %v1627_v27 = vsub.f32 0.0, %v1625_v26 }
 0xfc4   : > { %v1628_v28 = vsel %vm1626_vm5, %v1627_v27, %v1625_v26 }
 0xfc5   : > { %v1629_v30 = vadd.f32 1.0, %v1628_v28 }
 0xfc7   : > { %v1630_v31 = vmul.f32 %v1629_v30, %v1604_v29 }
 0xfc9   : > { %3700 = vmatmul.mubr.msk.f32.vlgmr.msra.gmra.mrb[12].mxu0 %vm620_vm1, %v1630_v31 }
 0xfca   : > { %3715 = vmatprep.mubr.msk.f32.mxu0 %vm4223_vm0, %v4224_v6 }
0x109c   : > { %v1716_v34 = vpop.f32.mrb[12].mxu0 }
0x109d   : > { %v1717_v35 = vadd.f32 %v1716_v34, %v1634_v33  ;;  %v3701_v36 = vpop.f32.mrb[13].mxu0 }
0x109f   : > { %v4671_v37 = vadd.f32 %v1717_v35, %v4634_v9  ;;  %v3268_v9 = vld [vmem:[%s5048_s5 + $0x28] sm:$0xff] }
0x10a0   : > { %v4006_v50 = vpack.c.bf16 %v3268_v9, %v3267_v43 }
0x10a1   : > { %v1728_v38 = vsel %vm620_vm1, %v4671_v37, 0.0 }
0x10a2   : > { %1729 = vadd.xlane.f32.xlu1 %v1728_v38  ;;  %4007 = vmatpush3.bf16.msra.mxu1 %v4006_v50 }
0x10a3   : > { %4008 = vmatprep.subr.bf16.mxu1 %v4222_v3 }
0x10a6   : > { %4010 = vmatpush3.bf16.msra.mxu1 %v4009_v54 }
0x10a7   : > { %3718 = vmatprep.subr.mxu1 %v4224_v6 }
0x112f   : > { %v1730_v39 = vpop.xlane.xlu1 %1729 }
0x1130   : > { %v1731_v40 = vmul.f32 0.03125, %v1730_v39 }
0x1132   : > { %v1732_v47 = vsub.f32 %v4671_v37, %v1731_v40 }
0x1134   : > { %v1733_v48 = vmul.f32 %v1732_v47, %v1732_v47 }
0x1136   : > { %v1734_v49 = vsel %vm620_vm1, %v1733_v48, 0.0 }
0x1137   : > { %1735 = vadd.xlane.f32.xlu0 %v1734_v49 }
0x11c4   : > { %v1736_v55 = vpop.xlane.xlu0 %1735 }
0x11c5   : > { %v1737_v56 = vmul.f32 0.03125, %v1736_v55 }
0x11c7   : > { %v1738_v57 = vadd.f32 1e-05, %v1737_v56 }
0x11c9   : > { %4190 = vrsqrt.f32 %v1738_v57 }
0x11d3   : > { %v4191_v60 = vpop.eup %4190 }
0x11d4   : > { %v1740_v53 = vmul.f32 %v4191_v60, %v1732_v47 }
0x11d6   : > { %v1745_v63 = vmul.f32 %v1744_v59, %v1740_v53 }
0x11d8   : > { %v1750_v0 = vadd.f32 %v1749_v62, %v1745_v63 }
0x11da   : > { %3711 = vmatmul.mubr.msk.f32.vlgmr.msra.gmra.mrb[16].mxu1 %vm620_vm1, %v1750_v0 }
0x11db   : > { %3720 = vmatprep.mubr.msk.f32.mxu1 %vm4223_vm0, %v4224_v6 }
0x12ad   : > { %v1833_v2 = vpop.f32.mrb[16].mxu1 }
0x12ae   : > { %v4708_v4 = vadd.f32 %v3272_v1, %v1833_v2  ;;  %v3712_v42 = vpop.f32.mrb[17].mxu1 }
0x12b0   : > { %2004 = vrot.lane.b32.xlu1 %v4708_v4, %s4227_s18  ;;  %1838 = vrot.lane.b32.xlu0 %v4708_v4, %s4226_s17 }
0x12b4   : > { %2002 = vrot.lane.b32.xlu1 %v4708_v4, %s4228_s19  ;;  %2170 = vrot.lane.b32.xlu0 %v4708_v4, %s4230_s21  ;;  %s329_s21 = scalar_lea.vmem %s5052_s9, %s3205_s28 }
0x12b8   : > { %2168 = vrot.lane.b32.xlu1 %v4708_v4, %s4231_s22  ;;  %2336 = vrot.lane.b32.xlu0 %v4708_v4, %s4232_s23 }
0x12bc   : > { %2334 = vrot.lane.b32.xlu1 %v4708_v4, %s4233_s24 }
0x1322   : > { %v2005_v44 = vpop.permute.xlu1 %2004  ;;  %v1839_v5 = vpop.permute.xlu0 %1838 }
0x1323   : > { %3714 = vmatpush3.xpose.msk.msra.mxu0 %vm732_vm2, %v1839_v5 }
0x1324   : > { %3723 = vmatprep.subr.mxu0 %v4224_v6 }
0x1326   : > { %v2003_v7 = vpop.permute.xlu1 %2002  ;;  %3716 = vmatmul.mubr.msk.f32.vlgmr.msra.gmra.mrb[14].mxu0 %vm732_vm2, %v4708_v4  ;;  %v2171_v8 = vpop.permute.xlu0 %2170 }
0x1327   : > { %3724 = vmatpush3.xpose.msk.msra.mxu0 %vm732_vm2, %v2005_v44  ;;  %3725 = vmatprep.mubr.msk.f32.mxu0 %vm4223_vm0, %v4224_v6 }
0x1328   : > { %3733 = vmatprep.subr.mxu0 %v4224_v6 }
0x132a   : > { %3726 = vmatmul.mubr.msk.f32.vlgmr.msra.gmra.mrb[16].mxu0 %vm732_vm2, %v2003_v7  ;;  %v2169_v10 = vpop.permute.xlu1 %2168  ;;  %v2337_v11 = vpop.permute.xlu0 %2336 }
0x132b   : > { %3734 = vmatpush3.xpose.msk.msra.mxu0 %vm732_vm2, %v2171_v8  ;;  %3735 = vmatprep.mubr.msk.f32.mxu0 %vm4223_vm0, %v4224_v6 }
0x132c   : > { %3743 = vmatprep.subr.mxu0 %v4224_v6 }
0x132e   : > { %3736 = vmatmul.mubr.msk.f32.vlgmr.msra.gmra.mrb[18].mxu0 %vm732_vm2, %v2169_v10  ;;  %v2335_v12 = vpop.permute.xlu1 %2334 }
0x132f   : > { %3744 = vmatpush3.xpose.msk.msra.mxu0 %vm732_vm2, %v2337_v11  ;;  %3745 = vmatprep.mubr.msk.f32.mxu0 %vm4223_vm0, %v4224_v6 }
0x1330   : > { %4011 = vmatprep.subr.bf16.mxu0 %v4222_v3 }
0x1332   : > { %3746 = vmatmul.mubr.msk.f32.vlgmr.msra.gmra.mrb[20].mxu0 %vm732_vm2, %v2335_v12  ;;  %v3262_v12 = vld [vmem:[%s5050_s7 + $0x20] sm:$0xff] }
0x1333   : > { %3761 = vmatprep.mubr.msk.f32.mxu0 %vm4223_vm0, %v4224_v6 }
0x13f9   : > { %v1910_v13 = vpop.f32.mrb[14].mxu0 }
0x13fa   : > { %v1914_v14 = vmul.f32 0.6, %v1910_v13  ;;  %v3717_v15 = vpop.f32.mrb[15].mxu0  ;;  %v3263_v13 = vld [vmem:[%s5050_s7 + $0x28] sm:$0xff] }
0x13fb   : > { %v3264_v15 = vld [vmem:[%s5050_s7 + $0x30] sm:$0xff] }
0x13fc   : > { %v1915_v17 = vsel %vm732_vm2, %v1914_v14, -inf }
0x13fd   : > { %1916 = vmax.xlane.f32.xlu0 %v1915_v17  ;;  %v2076_v18 = vpop.f32.mrb[16].mxu0  ;;  %v3265_v17 = vld [vmem:[%s5050_s7 + $0x38] sm:$0xff] }
0x13fe   : > { %v2080_v19 = vmul.f32 0.6, %v2076_v18  ;;  %v3727_v20 = vpop.f32.mrb[17].mxu0  ;;  %v4015_v18 = vpack.c.bf16 %v3265_v17, %v3264_v15 }
0x1400   : > { %v2081_v21 = vsel %vm732_vm2, %v2080_v19, -inf }
0x1401   : > { %2082 = vmax.xlane.f32.xlu1 %v2081_v21  ;;  %v2242_v22 = vpop.f32.mrb[18].mxu0 }
0x1402   : > { %v2246_v24 = vmul.f32 0.6, %v2242_v22  ;;  %v3737_v25 = vpop.f32.mrb[19].mxu0 }
0x1404   : > { %v2247_v26 = vsel %vm732_vm2, %v2246_v24, -inf }
0x1405   : > { %2248 = vmax.xlane.f32.xlu0 %v2247_v26  ;;  %v2408_v27 = vpop.f32.mrb[20].mxu0 }
0x1406   : > { %v2412_v28 = vmul.f32 0.6, %v2408_v27  ;;  %v3747_v29 = vpop.f32.mrb[21].mxu0 }
0x1408   : > { %v2413_v30 = vsel %vm732_vm2, %v2412_v28, -inf }
0x1409   : > { %2414 = vmax.xlane.f32.xlu0 %v2413_v30 }
0x1412   : > { %1926 = vrot.lane.b32.xlu1 %v4708_v4, %s4225_s16 }
0x148a   : > { %v1917_v31 = vpop.xlane.xlu0 %1916 }
0x148b   : > { %v1918_v33 = vsub.f32 %v1914_v14, %v1917_v31  ;;  %v4012_v14 = vpack.c.bf16 %v3263_v13, %v3262_v12 }
0x148d   : > { %v1919_v34 = vmul.f32 1.442695, %v1918_v33  ;;  %4013 = vmatpush3.bf16.msra.mxu0 %v4012_v14 }
0x148e   : > { %v2083_v35 = vpop.xlane.xlu1 %2082  ;;  %4014 = vmatprep.subr.bf16.mxu0 %v4222_v3 }
0x148f   : > { %4192 = vpow2.f32 %v1919_v34  ;;  %v2084_v36 = vsub.f32 %v2080_v19, %v2083_v35  ;;  %v2518_v35 = vrot.slane %v4694_v58, %v1412_v16 }
0x1491   : > { %v2085_v38 = vmul.f32 1.442695, %v2084_v36  ;;  %4016 = vmatpush3.bf16.msra.mxu0 %v4015_v18 }
0x1492   : > { %v1927_v39 = vpop.permute.xlu1 %1926  ;;  %v2249_v40 = vpop.xlane.xlu0 %2248  ;;  %4023 = vmatprep.subr.bf16.mxu0 %v4222_v3 }
0x1493   : > { %4194 = vpow2.f32 %v2085_v38  ;;  %v2250_v47 = vsub.f32 %v2246_v24, %v2249_v40  ;;  %3719 = vmatpush3.msra.mxu1 %v1927_v39 }
0x1494   : > { %3728 = vmatprep.subr.mxu1 %v4224_v6 }
0x1495   : > { %v2251_v48 = vmul.f32 1.442695, %v2250_v47 }
0x1496   : > { %v2415_v49 = vpop.xlane.xlu0 %2414 }
0x1497   : > { %4196 = vpow2.f32 %v2251_v48  ;;  %v2416_v43 = vsub.f32 %v2412_v28, %v2415_v49  ;;  %v4151_v48 = vpack.i.bf16 %v3265_v17, %v3264_v15  ;;  %v2833_v15 = vld [vmem:[%s5046_s3 + $0x30] sm:$0xff]  ;;  %v2834_v17 = vld [vmem:[%s5046_s3 + $0x38] sm:$0xff] }
0x1498   : > { %v4039_v18 = vpack.c.bf16 %v2834_v17, %v2833_v15  ;;  %v3297_v17 = vld [vmem:[%s5046_s3 + $0x90] sm:$0xff] }
0x1499   : > { %v4193_v9 = vpop.eup %4192  ;;  %v2417_v50 = vmul.f32 1.442695, %v2416_v43 }
0x149a   : > { %v1921_v51 = vsel %vm732_vm2, %v4193_v9, 0.0 }
0x149b   : > { %4198 = vpow2.f32 %v2417_v50  ;;  %1922 = vadd.xlane.f32.xlu1 %v1921_v51  ;;  %v4146_v51 = vpack.i.bf16 %v3263_v13, %v3262_v12  ;;  %v2831_v12 = vld [vmem:[%s5046_s3 + $0x20] sm:$0xff]  ;;  %v2832_v13 = vld [vmem:[%s5046_s3 + $0x28] sm:$0xff] }
0x149c   : > { %v4036_v14 = vpack.c.bf16 %v2832_v13, %v2831_v12 }
0x149d   : > { %v4195_v52 = vpop.eup %4194 }
0x149e   : > { %v2087_v54 = vsel %vm732_vm2, %v4195_v52, 0.0 }
0x149f   : > { %2088 = vadd.xlane.f32.xlu0 %v2087_v54 }
0x14a1   : > { %v4197_v55 = vpop.eup %4196 }
0x14a2   : > { %v2253_v56 = vsel %vm732_vm2, %v4197_v55, 0.0 }
0x14a3   : > { %2254 = vadd.xlane.f32.xlu1 %v2253_v56 }
0x14a5   : > { %v4199_v57 = vpop.eup %4198 }
0x14a6   : > { %v2419_v59 = vsel %vm732_vm2, %v4199_v57, 0.0 }
0x14a7   : > { %2420 = vadd.xlane.f32.xlu0 %v2419_v59 }
0x14b4   : > { %2258 = vrot.lane.b32.xlu1 %v4708_v4, %s4235_s26  ;;  %s5056_s26 = smov 8  }
0x14b8   : > { %2424 = vrot.lane.b32.xlu1 %v4708_v4, %s4234_s25 }
0x14bd   : > { %2092 = vrot.lane.b32.xlu0 %v4708_v4, %s4229_s20 }
0x1528   : > { %v1923_v60 = vpop.xlane.xlu1 %1922 }
0x1529   : > { %4200 = vrcp.f32 %v1923_v60 }
0x152c   : > { %v2089_v53 = vpop.xlane.xlu0 %2088 }
0x152d   : > { %4202 = vrcp.f32 %v2089_v53 }
0x1530   : > { %v2255_v62 = vpop.xlane.xlu1 %2254 }
0x1531   : > { %4204 = vrcp.f32 %v2255_v62 }
0x1533   : > { %v4201_v63 = vpop.eup %4200 }
0x1534   : > { %v1925_v0 = vmul.f32 %v4201_v63, %v4193_v9  ;;  %v2421_v1 = vpop.xlane.xlu0 %2420  ;;  %v2259_v44 = vpop.permute.xlu1 %2258 }
0x1535   : > { %4206 = vrcp.f32 %v2421_v1  ;;  %v2609_v1 = vrot.slane %v4694_v58, %v1503_v45  ;;  %v2829_v45 = vld [vmem:[%s5046_s3 + $0x10] sm:$0xff] }
0x1536   : > { %3721 = vmatmul.mubr.msk.f32.vlgmr.msra.gmra.mrb[18].mxu1 %vm732_vm2, %v1925_v0 }
0x1537   : > { %v4203_v2 = vpop.eup %4202  ;;  %3730 = vmatprep.mubr.msk.f32.mxu1 %vm4223_vm0, %v4224_v6 }
0x1538   : > { %v2091_v42 = vmul.f32 %v4203_v2, %v4195_v52  ;;  %v2093_v5 = vpop.permute.xlu0 %2092  ;;  %v2425_v8 = vpop.permute.xlu1 %2424 }
0x1539   : > { %3729 = vmatpush3.msra.mxu1 %v2093_v5  ;;  %v2827_v5 = vld [vmem:[%s5046_s3] sm:$0xff] }
0x153a   : > { %3731 = vmatmul.mubr.msk.f32.vlgmr.msra.gmra.mrb[20].mxu1 %vm732_vm2, %v2091_v42  ;;  %3738 = vmatprep.subr.mxu1 %v4224_v6 }
0x153b   : > { %v4205_v4 = vpop.eup %4204  ;;  %3739 = vmatpush3.msra.mxu1 %v2259_v44  ;;  %3740 = vmatprep.mubr.msk.f32.mxu1 %vm4223_vm0, %v4224_v6  ;;  %v2614_v44 = vrot.slane %v4694_v58, %v1508_v46 }
0x153c   : > { %v2257_v7 = vmul.f32 %v4205_v4, %v4197_v55  ;;  %3748 = vmatprep.subr.mxu1 %v4224_v6  ;;  %v2828_v4 = vld [vmem:[%s5046_s3 + $0x8] sm:$0xff] }
0x153e   : > { %3741 = vmatmul.mubr.msk.f32.vlgmr.msra.gmra.mrb[22].mxu1 %vm732_vm2, %v2257_v7 }
0x153f   : > { %v4207_v10 = vpop.eup %4206  ;;  %3749 = vmatpush3.msra.mxu1 %v2425_v8  ;;  %3750 = vmatprep.mubr.msk.f32.mxu1 %vm4223_vm0, %v4224_v6  ;;  %v4030_v8 = vpack.c.bf16 %v2828_v4, %v2827_v5 }
0x1540   : > { %v2423_v11 = vmul.f32 %v4207_v10, %v4199_v57  ;;  %4017 = vmatprep.subr.bf16.mxu1 %v4222_v3 }
0x1542   : > { %3751 = vmatmul.mubr.msk.f32.vlgmr.msra.gmra.mrb[24].mxu1 %vm732_vm2, %v2423_v11  ;;  %v2830_v11 = vld [vmem:[%s5046_s3 + $0x18] sm:$0xff] }
0x1543   : > { %3772 = vmatprep.mubr.msk.f32.mxu1 %vm4223_vm0, %v4224_v6  ;;  %v4033_v46 = vpack.c.bf16 %v2830_v11, %v2829_v45  ;;  %v3295_v45 = vld [vmem:[%s5046_s3 + $0x80] sm:$0xff]  ;;  %v3296_v11 = vld [vmem:[%s5046_s3 + $0x88] sm:$0xff] }
0x1609   : > { %v1998_v19 = vpop.f32.mrb[18].mxu1 }
0x160a   : > { %v3722_v20 = vpop.f32.mrb[19].mxu1 }
0x160b   : > { %v2836_v20 = vld [vmem:[%s5046_s3 + $0x48] sm:$0xff] }
0x160d   : > { %v2164_v21 = vpop.f32.mrb[20].mxu1 }
0x160e   : > { %2501 = vrot.lane.b32.xlu0 %v2164_v21, %s5056_s26  ;;  %v3732_v22 = vpop.f32.mrb[21].mxu1 }
0x160f   : > { %v2837_v22 = vld [vmem:[%s5046_s3 + $0x50] sm:$0xff] }
0x1611   : > { %v2330_v24 = vpop.f32.mrb[22].mxu1 }
0x1612   : > { %2505 = vrot.lane.b32.xlu1 %v2330_v24, %s5057_s12  ;;  %v3742_v25 = vpop.f32.mrb[23].mxu1  ;;  %v2838_v24 = vld [vmem:[%s5046_s3 + $0x58] sm:$0xff] }
0x1613   : > { %v4045_v25 = vpack.c.bf16 %v2838_v24, %v2837_v22  ;;  %v3301_v24 = vld [vmem:[%s5046_s3 + $0xb0] sm:$0xff] }
0x1615   : > { %v2496_v26 = vpop.f32.mrb[24].mxu1 }
0x1616   : > { %2509 = vrot.lane.b32.xlu0 %v2496_v26, %s5058_s13  ;;  %v3752_v27 = vpop.f32.mrb[25].mxu1  ;;  %v2839_v26 = vld [vmem:[%s5046_s3 + $0x60] sm:$0xff] }
0x1617   : > { %v2840_v27 = vld [vmem:[%s5046_s3 + $0x68] sm:$0xff] }
0x1680   : > { %v2502_v28 = vpop.permute.xlu0 %2501 }
0x1681   : > { %v2512_v30 = vsel %vm732_vm2, %v1998_v19, %v2502_v28  ;;  %v2835_v19 = vld [vmem:[%s5046_s3 + $0x40] sm:$0xff]  ;;  %v4048_v28 = vpack.c.bf16 %v2840_v27, %v2839_v26 }
0x1682   : > { %v4042_v21 = vpack.c.bf16 %v2836_v20, %v2835_v19  ;;  %v3299_v20 = vld [vmem:[%s5046_s3 + $0xa0] sm:$0xff] }
0x1683   : > { %v3303_v27 = vld [vmem:[%s5046_s3 + $0xc0] sm:$0xff] }
0x1684   : > { %v2506_v29 = vpop.permute.xlu1 %2505 }
0x1685   : > { %v2513_v31 = vsel %vm1406_vm3, %v2512_v30, %v2506_v29  ;;  %v2841_v29 = vld [vmem:[%s5046_s3 + $0x70] sm:$0xff]  ;;  %v2842_v30 = vld [vmem:[%s5046_s3 + $0x78] sm:$0xff] }
0x1688   : > { %v2510_v33 = vpop.permute.xlu0 %2509 }
0x1689   : > { %v2514_v34 = vsel %vm1408_vm4, %v2513_v31, %v2510_v33  ;;  %v4051_v31 = vpack.c.bf16 %v2842_v30, %v2841_v29  ;;  %v3305_v30 = vld [vmem:[%s5046_s3 + $0xd0] sm:$0xff] }
0x168a   : > { %3762 = vmatmul.mubr.msk.f32.vlgmr.msra.gmra.mrb[22].mxu0 %vm620_vm1, %v2514_v34 }
0x168b   : > { %3783 = vmatprep.mubr.msk.f32.mxu0 %vm4223_vm0, %v4224_v6 }
0x175d   : > { %v2588_v36 = vpop.f32.mrb[22].mxu0 }
0x175e   : > { %v2589_v38 = vadd.f32 %v2588_v36, %v2518_v35  ;;  %v3763_v39 = vpop.f32.mrb[23].mxu0 }
0x1760   : > { %v4804_v40 = vadd.f32 %v2589_v38, %v4671_v37 }
0x1762   : > { %v2593_v47 = vsel %vm620_vm1, %v4804_v40, 0.0 }
0x1763   : > { %2594 = vadd.xlane.f32.xlu1 %v2593_v47 }
0x1774   : > { %4152 = vrot.lane.b32.xlu1 %v4151_v48, %s4226_s17 }
0x1778   : > { %4157 = vrot.lane.b32.xlu1 %v4146_v51, %s4225_s16 }
0x17f0   : > { %v2595_v49 = vpop.xlane.xlu1 %2594 }
0x17f1   : > { %v2596_v43 = vmul.f32 0.03125, %v2595_v49 }
0x17f3   : > { %v2597_v9 = vsub.f32 %v4804_v40, %v2596_v43 }
0x17f4   : > { %v4153_v55 = vpop.permute.xlu1 %4152 }
0x17f5   : > { %v2598_v50 = vmul.f32 %v2597_v9, %v2597_v9  ;;  %v4155_v59 = vunpack.i.h.bf16 %v4153_v55  ;;  %v4154_v62 = vunpack.i.l.bf16 %v4153_v55 }
0x17f7   : > { %v2599_v16 = vsel %vm620_vm1, %v2598_v50, 0.0  ;;  %v4021_v0 = vpack.c.bf16 %v4155_v59, %v4154_v62 }
0x17f8   : > { %2600 = vadd.xlane.f32.xlu0 %v2599_v16  ;;  %v4158_v33 = vpop.permute.xlu1 %4157 }
0x17f9   : > { %v4160_v34 = vunpack.i.h.bf16 %v4158_v33  ;;  %v4159_v35 = vunpack.i.l.bf16 %v4158_v33 }
0x17fb   : > { %v4024_v36 = vpack.c.bf16 %v4160_v34, %v4159_v35  ;;  %v3307_v34 = vld [vmem:[%s5046_s3 + $0xe0] sm:$0xff]  ;;  %v3308_v35 = vld [vmem:[%s5046_s3 + $0xe8] sm:$0xff] }
0x17fd   : > { %4025 = vmatpush3.bf16.msra.mxu0 %v4024_v36  ;;  %v4072_v36 = vpack.c.bf16 %v3308_v35, %v3307_v34 }
0x17fe   : > { %4026 = vmatprep.subr.bf16.mxu0 %v4222_v3 }
0x180e   : > { %4147 = vrot.lane.b32.xlu0 %v4146_v51, %s4226_s17 }
0x1812   : > { %4162 = vrot.lane.b32.xlu0 %v4151_v48, %s4225_s16 }
0x1885   : > { %v2601_v52 = vpop.xlane.xlu0 %2600 }
0x1886   : > { %v2602_v54 = vmul.f32 0.03125, %v2601_v52 }
0x1888   : > { %v2603_v56 = vadd.f32 1e-05, %v2602_v54 }
0x1889   : > { %v4148_v57 = vpop.permute.xlu0 %4147 }
0x188a   : > { %4208 = vrsqrt.f32 %v2603_v56  ;;  %v4150_v60 = vunpack.i.h.bf16 %v4148_v57  ;;  %v4149_v53 = vunpack.i.l.bf16 %v4148_v57 }
0x188c   : > { %v4018_v63 = vpack.c.bf16 %v4150_v60, %v4149_v53 }
0x188d   : > { %v4163_v38 = vpop.permute.xlu0 %4162 }
0x188e   : > { %4019 = vmatpush3.bf16.msra.mxu1 %v4018_v63  ;;  %v4165_v39 = vunpack.i.h.bf16 %v4163_v38  ;;  %v4164_v47 = vunpack.i.l.bf16 %v4163_v38  ;;  %v3309_v38 = vld [vmem:[%s5046_s3 + $0xf0] sm:$0xff] }
0x188f   : > { %4020 = vmatprep.subr.bf16.mxu1 %v4222_v3 }
0x1892   : > { %4022 = vmatpush3.bf16.msra.mxu1 %v4021_v0 }
0x1893   : > { %4029 = vmatprep.subr.bf16.mxu1 %v4222_v3 }
0x1894   : > { %v4209_v2 = vpop.eup %4208 }
0x1895   : > { %v2605_v42 = vmul.f32 %v4209_v2, %v2597_v9 }
0x1897   : > { %v2610_v7 = vmul.f32 %v2609_v1, %v2605_v42 }
0x1899   : > { %v2615_v10 = vadd.f32 %v2614_v44, %v2610_v7 }
0x189b   : > { %3773 = vmatmul.mubr.msk.f32.vlgmr.msra.gmra.mrb[26].mxu1 %vm620_vm1, %v2615_v10 }
0x189c   : > { %4031 = vmatpush3.bf16.msra.mxu1 %v4030_v8  ;;  %3818 = vmatprep.mubr.msk.f32.mxu1 %vm4223_vm0, %v4224_v6 }
0x189d   : > { %4032 = vmatprep.subr.bf16.mxu1 %v4222_v3 }
0x18a0   : > { %4034 = vmatpush3.bf16.msra.mxu1 %v4033_v46 }
0x18a1   : > { %4035 = vmatprep.subr.bf16.mxu1 %v4222_v3 }
0x18a4   : > { %4037 = vmatpush3.bf16.msra.mxu1 %v4036_v14  ;;  %v4054_v14 = vpack.c.bf16 %v3296_v11, %v3295_v45 }
0x18a5   : > { %4038 = vmatprep.subr.bf16.mxu1 %v4222_v3 }
0x18a8   : > { %4040 = vmatpush3.bf16.msra.mxu1 %v4039_v18  ;;  %v3298_v18 = vld [vmem:[%s5046_s3 + $0x98] sm:$0xff] }
0x18a9   : > { %4041 = vmatprep.subr.bf16.mxu1 %v4222_v3  ;;  %v4057_v19 = vpack.c.bf16 %v3298_v18, %v3297_v17  ;;  %v3330_v17 = vld [vmem:[%s5047_s4 + $0x2] ss:$0 sm:$0xff] }
0x18ac   : > { %4043 = vmatpush3.bf16.msra.mxu1 %v4042_v21  ;;  %v3300_v21 = vld [vmem:[%s5046_s3 + $0xa8] sm:$0xff] }
0x18ad   : > { %4044 = vmatprep.subr.bf16.mxu1 %v4222_v3  ;;  %v4060_v22 = vpack.c.bf16 %v3300_v21, %v3299_v20 }
0x18b0   : > { %4046 = vmatpush3.bf16.msra.mxu1 %v4045_v25  ;;  %v3302_v25 = vld [vmem:[%s5046_s3 + $0xb8] sm:$0xff] }
0x18b1   : > { %4047 = vmatprep.subr.bf16.mxu1 %v4222_v3  ;;  %v4063_v26 = vpack.c.bf16 %v3302_v25, %v3301_v24 }
0x18b4   : > { %4049 = vmatpush3.bf16.msra.mxu1 %v4048_v28  ;;  %v3304_v28 = vld [vmem:[%s5046_s3 + $0xc8] sm:$0xff] }
0x18b5   : > { %4050 = vmatprep.subr.bf16.mxu1 %v4222_v3  ;;  %v4066_v29 = vpack.c.bf16 %v3304_v28, %v3303_v27 }
0x18b8   : > { %4052 = vmatpush3.bf16.msra.mxu1 %v4051_v31  ;;  %v3306_v31 = vld [vmem:[%s5046_s3 + $0xd8] sm:$0xff] }
0x18b9   : > { %4077 = vmatprep.subr.bf16.mxu1 %v4222_v3  ;;  %v4069_v33 = vpack.c.bf16 %v3306_v31, %v3305_v30 }
0x18bb   : > { %3819 = vmatmul.mubr.msk.f32.vlgmr.msra.gmra.mrb[28].mxu1 %vm620_vm1, %v4493_v23  ;;  %v4027_v23 = vpack.c.bf16 %v4165_v39, %v4164_v47  ;;  %v3310_v39 = vld [vmem:[%s5046_s3 + $0xf8] sm:$0xff] }
0x18bc   : > { %3821 = vmatprep.mubr.msk.f32.mxu1 %vm4223_vm0, %v4224_v6  ;;  %v4075_v47 = vpack.c.bf16 %v3310_v39, %v3309_v38 }
0x18bd   : > { %4028 = vmatpush3.bf16.msra.mxu0 %v4027_v23  ;;  %v4955_v23 = vld [vmem:[%s5047_s4] ss:$0 sm:$0xff] }
0x18be   : > { %4053 = vmatprep.subr.bf16.mxu0 %v4222_v3 }
0x18bf   : > { %3822 = vmatmul.mubr.msk.f32.gmra.mrb[30].mxu1 %vm620_vm1, %v4671_v37  ;;  %v2619_v37 = vrot.slane %v4694_v58, %v1513_v61 }
0x18c0   : > { %3824 = vmatprep.mubr.msk.f32.mxu1 %vm4223_vm0, %v4224_v6 }
0x196e   : > { %v2705_v48 = vpop.f32.mrb[26].mxu1 }
0x196f   : > { %v2706_v49 = vadd.f32 %v2705_v48, %v2619_v37  ;;  %v3774_v43 = vpop.f32.mrb[27].mxu1 }
0x1970   : > { %v3314_v43 = vld [vmem:[%s5046_s3 + $0x108] sm:$0xff] }
0x1971   : > { %v2710_v9 = vmul.f32 0.70710677, %v2706_v49  ;;  %v2709_v12 = vmul.f32 0.5, %v2706_v49  ;;  %v3313_v49 = vld [vmem:[%s5046_s3 + $0x100] sm:$0xff] }
0x1973   : > { %v2711_v50 = vand.u32 2147483647, %v2710_v9  ;;  %vm2731_vm6 = vcmp.lt.f32.partialorder %v2710_v9, 0.0  ;;  %v4078_v9 = vpack.c.bf16 %v3314_v43, %v3313_v49 }
0x1975   : > { %v2712_v16 = vmul.f32 0.3275911, %v2711_v50  ;;  %v2725_v52 = vsub.f32 0.0, %v2711_v50  ;;  %4079 = vmatpush3.bf16.msra.mxu1 %v4078_v9 }
0x1976   : > { %4080 = vmatprep.subr.bf16.mxu1 %v4222_v3 }
0x1977   : > { %v2713_v51 = vadd.f32 1.0, %v2712_v16  ;;  %v2726_v55 = vmul.f32 %v2725_v52, %v2711_v50  ;;  %v3315_v50 = vld [vmem:[%s5046_s3 + $0x110] sm:$0xff]  ;;  %v3316_v16 = vld [vmem:[%s5046_s3 + $0x118] sm:$0xff] }
0x1978   : > { %v4081_v52 = vpack.c.bf16 %v3316_v16, %v3315_v50 }
0x1979   : > { %4210 = vrcp.f32 %v2713_v51  ;;  %v2727_v59 = vmul.f32 1.442695, %v2726_v55  ;;  %v3317_v51 = vld [vmem:[%s5046_s3 + $0x120] sm:$0xff] }
0x197a   : > { %4082 = vmatpush3.bf16.msra.mxu1 %v4081_v52 }
0x197b   : > { %4212 = vpow2.f32 %v2727_v59  ;;  %4083 = vmatprep.subr.bf16.mxu1 %v4222_v3 }
0x1983   : > { %v4211_v54 = vpop.eup %4210 }
0x1984   : > { %v2716_v56 = vmul.f32 1.0614054, %v4211_v54 }
0x1985   : > { %v4213_v4 = vpop.eup %4212 }
0x1986   : > { %v3288_v57 = vadd.f32 -1.4531521, %v2716_v56  ;;  %v3319_v56 = vld [vmem:[%s5046_s3 + $0x130] sm:$0xff] }
0x1988   : > { %v2718_v60 = vmul.f32 %v4211_v54, %v3288_v57  ;;  %v3320_v57 = vld [vmem:[%s5046_s3 + $0x138] sm:$0xff] }
0x1989   : > { %v4087_v59 = vpack.c.bf16 %v3320_v57, %v3319_v56 }
0x198a   : > { %v2719_v53 = vadd.f32 1.4214138, %v2718_v60  ;;  %v3321_v60 = vld [vmem:[%s5046_s3 + $0x140] sm:$0xff] }
0x198c   : > { %v2720_v62 = vmul.f32 %v4211_v54, %v2719_v53  ;;  %v3322_v53 = vld [vmem:[%s5046_s3 + $0x148] sm:$0xff] }
0x198e   : > { %v3289_v63 = vadd.f32 -0.28449672, %v2720_v62  ;;  %v2916_v61 = vpop.f32.mrb[28].mxu1  ;;  %v4090_v62 = vpack.c.bf16 %v3322_v53, %v3321_v60 }
0x198f   : > { %v3820_v0 = vpop.f32.mrb[29].mxu1  ;;  %v2917_v37 = vadd.f32 %v4955_v23, %v2916_v61  ;;  %v3324_v61 = vld [vmem:[%s5046_s3 + $0x158] sm:$0xff] }
0x1990   : > { %v2722_v1 = vmul.f32 %v4211_v54, %v3289_v63  ;;  %v3323_v63 = vld [vmem:[%s5046_s3 + $0x150] sm:$0xff] }
0x1991   : > { %v4093_v0 = vpack.c.bf16 %v3324_v61, %v3323_v63 }
0x1992   : > { %v2723_v2 = vadd.f32 0.2548296, %v2722_v1  ;;  %v2921_v42 = vpop.f32.mrb[30].mxu1  ;;  %v3325_v1 = vld [vmem:[%s5046_s3 + $0x160] sm:$0xff] }
0x1993   : > { %v3823_v44 = vpop.f32.mrb[31].mxu1  ;;  %v2922_v48 = vadd.f32 %v4955_v23, %v2921_v42 }
0x1994   : > { %v2724_v5 = vmul.f32 %v4211_v54, %v2723_v2  ;;  %v3318_v54 = vld [vmem:[%s5046_s3 + $0x128] sm:$0xff]  ;;  %v3327_v44 = vld [vmem:[%s5046_s3 + $0x170] sm:$0xff] }
0x1995   : > { %v4084_v55 = vpack.c.bf16 %v3318_v54, %v3317_v51  ;;  %v3326_v2 = vld [vmem:[%s5046_s3 + $0x168] sm:$0xff] }
0x1996   : > { %v2729_v7 = vmul.f32 %v4213_v4, %v2724_v5  ;;  %v4096_v42 = vpack.c.bf16 %v3326_v2, %v3325_v1  ;;  %v3328_v5 = vld [vmem:[%s5046_s3 + $0x178] sm:$0xff] }
0x1997   : > { %4085 = vmatpush3.bf16.msra.mxu1 %v4084_v55  ;;  %v4099_v4 = vpack.c.bf16 %v3328_v5, %v3327_v44 }
0x1998   : > { %v2730_v8 = vsub.f32 1.0, %v2729_v7  ;;  %4086 = vmatprep.subr.bf16.mxu1 %v4222_v3  ;;  %v2739_v7 = vrot.slane %v4694_v58, %v1633_v32 }
0x199a   : > { %v2732_v10 = vsub.f32 0.0, %v2730_v8 }
0x199b   : > { %4088 = vmatpush3.bf16.msra.mxu1 %v4087_v59 }
0x199c   : > { %v2733_v46 = vsel %vm2731_vm6, %v2732_v10, %v2730_v8  ;;  %4089 = vmatprep.subr.bf16.mxu1 %v4222_v3 }
0x199d   : > { %v2734_v13 = vadd.f32 1.0, %v2733_v46 }
0x199f   : > { %v2735_v15 = vmul.f32 %v2734_v13, %v2709_v12  ;;  %4091 = vmatpush3.bf16.msra.mxu1 %v4090_v62 }
0x19a0   : > { %4092 = vmatprep.subr.bf16.mxu1 %v4222_v3 }
0x19a1   : > { %3784 = vmatmul.mubr.msk.f32.vlgmr.msra.gmra.mrb[24].mxu0 %vm620_vm1, %v2735_v15 }
0x19a2   : > { %4055 = vmatpush3.bf16.msra.mxu0 %v4054_v14  ;;  %3859 = vmatprep.mubr.msk.f32.mxu0 %vm4223_vm0, %v4224_v6 }
0x19a3   : > { %4056 = vmatprep.subr.bf16.mxu0 %v4222_v3  ;;  %4094 = vmatpush3.bf16.msra.mxu1 %v4093_v0 }
0x19a4   : > { %4095 = vmatprep.subr.bf16.mxu1 %v4222_v3 }
0x19a6   : > { %4058 = vmatpush3.bf16.msra.mxu0 %v4057_v19 }
0x19a7   : > { %4059 = vmatprep.subr.bf16.mxu0 %v4222_v3  ;;  %4097 = vmatpush3.bf16.msra.mxu1 %v4096_v42 }
0x19a8   : > { %4098 = vmatprep.subr.bf16.mxu1 %v4222_v3 }
0x19aa   : > { %4061 = vmatpush3.bf16.msra.mxu0 %v4060_v22 }
0x19ab   : > { %4062 = vmatprep.subr.bf16.mxu0 %v4222_v3  ;;  %4100 = vmatpush3.bf16.msra.mxu1 %v4099_v4 }
0x19ae   : > { %4064 = vmatpush3.bf16.msra.mxu0 %v4063_v26 }
0x19af   : > { %4065 = vmatprep.subr.bf16.mxu0 %v4222_v3 }
0x19b2   : > { %4067 = vmatpush3.bf16.msra.mxu0 %v4066_v29 }
0x19b3   : > { %4068 = vmatprep.subr.bf16.mxu0 %v4222_v3 }
0x19b6   : > { %4070 = vmatpush3.bf16.msra.mxu0 %v4069_v33 }
0x19b7   : > { %4071 = vmatprep.subr.bf16.mxu0 %v4222_v3 }
0x19ba   : > { %4073 = vmatpush3.bf16.msra.mxu0 %v4072_v36 }
0x19bb   : > { %4074 = vmatprep.subr.bf16.mxu0 %v4222_v3  ;;  %v3312_v3 = vld [vmem:[%s5047_s4 + $0x1] ss:$0 sm:$0xff] }
0x19be   : > { %4076 = vmatpush3.bf16.msra.mxu0 %v4075_v47 }
0x19c1   : > { %3860 = vmatmul.mubr.f32.vlgmr.msra.gmra.mrb[26].mxu0 %v2917_v37 }
0x19c2   : > { %3862 = vmatprep.mubr.msk.f32.mxu0 %vm4223_vm0, %v4224_v6 }
0x19c5   : > { %3863 = vmatmul.mubr.f32.gmra.mrb[28].mxu0 %v2922_v48 }
0x19c6   : > { %3865 = vmatprep.mubr.msk.f32.mxu0 %vm4223_vm0, %v4224_v6 }
0x1a74   : > { %v2821_v8 = vpop.f32.mrb[24].mxu0 }
0x1a75   : > { %v2822_v10 = vadd.f32 %v2821_v8, %v2739_v7  ;;  %v3785_v45 = vpop.f32.mrb[25].mxu0 }
0x1a77   : > { %v2825_v11 = vadd.f32 %v2822_v10, %v4804_v40 }
0x1a79   : > { %3825 = vmatmul.mubr.msk.f32.gmra.mrb[32].mxu1 %vm620_vm1, %v2825_v11 }
0x1a7a   : > { %3900 = vmatprep.mubr.msk.f32.mxu1 %vm4223_vm0, %v4224_v6 }
0x1a94   : > { %v3021_v46 = vpop.f32.mrb[26].mxu0 }
0x1a95   : > { %v3022_v12 = vadd.f32 %v3312_v3, %v3021_v46  ;;  %v3861_v41 = vpop.f32.mrb[27].mxu0 }
0x1a97   : > { %3901 = vmatmul.mubr.f32.vlgmr.msra.gmra.mrb[34].mxu1 %v3022_v12 }
0x1a98   : > { %v3026_v32 = vpop.f32.mrb[28].mxu0  ;;  %3903 = vmatprep.mubr.msk.f32.mxu1 %vm4223_vm0, %v4224_v6 }
0x1a99   : > { %v3027_v58 = vadd.f32 %v3312_v3, %v3026_v32  ;;  %v3864_v40 = vpop.f32.mrb[29].mxu0 }
0x1a9b   : > { %3904 = vmatmul.mubr.f32.gmra.mrb[36].mxu1 %v3027_v58 }
0x1a9c   : > { %3906 = vmatprep.mubr.msk.f32.mxu1 %vm4223_vm0, %v4224_v6 }
0x1b4c   : > { %v2926_v13 = vpop.f32.mrb[32].mxu1 }
0x1b4d   : > { %v2927_v14 = vadd.f32 %v4955_v23, %v2926_v13  ;;  %v3826_v15 = vpop.f32.mrb[33].mxu1 }
0x1b4f   : > { %3866 = vmatmul.mubr.f32.gmra.mrb[30].mxu0 %v2927_v14 }
0x1b6a   : > { %v3126_v18 = vpop.f32.mrb[34].mxu1 }
0x1b6b   : > { %v3127_v19 = vadd.f32 %v3330_v17, %v3126_v18  ;;  %v3902_v6 = vpop.f32.mrb[35].mxu1 }
0x1b6d   : > { %3140 = vst [vmem:[%s329_s21] sm:$0xff] %v3127_v19 }
0x1b6e   : > { %v3131_v20 = vpop.f32.mrb[36].mxu1 }
0x1b6f   : > { %v3132_v21 = vadd.f32 %v3330_v17, %v3131_v20  ;;  %v3905_v22 = vpop.f32.mrb[37].mxu1 }
0x1b71   : > { %3141 = vst [vmem:[%s329_s21 + $0x8] sm:$0xff] %v3132_v21 }
0x1c22   : > { %v3031_v24 = vpop.f32.mrb[30].mxu0 }
0x1c23   : > { %v3032_v25 = vadd.f32 %v3312_v3, %v3031_v24  ;;  %v3867_v26 = vpop.f32.mrb[31].mxu0 }
0x1c25   : > { %3907 = vmatmul.mubr.f32.gmra.mrb[38].mxu1 %v3032_v25 }
0x1cf8   : > { %v3136_v27 = vpop.f32.mrb[38].mxu1 }
0x1cf9   : > { %v3137_v28 = vadd.f32 %v3330_v17, %v3136_v27  ;;  %v3908_v29 = vpop.f32.mrb[39].mxu1 }
0x1cfb   : > { %3142 = vst [vmem:[%s329_s21 + $0x10] sm:$0xff] %v3137_v28 }
0x1cfc PF: > { %s19_s30 = sadd.s32 1, %s4220_s30  }
0x1cfd   : > { %p16_p5 = scmp.ge.s32.totalorder %s19_s30, 4  }
0x1cff   :  { %18 = sbr.rel (!%p16_p5) target bundleno = 1 (0x1), region = 98 }

</bundles_post_ra>
